<compile_context>
chip_gen: v7x
topology: tpu7x:2x2x1
jax: 0.10.0
libtpu: 0.0.40
codegen_flags: <defaults>
</compile_context>

<pallas_src>
import functools

import jax
import jax.numpy as jnp
from jax.experimental import pallas as pl
from jax.experimental.pallas import tpu as pltpu


# ----------------------------- kernels -----------------------------

def _patch_embed_kernel(p_ref, w_ref, add_ref, o_ref, *, batch):
    # p_ref: (tp*B, C*ps*ps) patches, w_ref: (C*ps*ps, E), add_ref: (tp, E) = pos + conv_bias
    y = jnp.dot(p_ref[...], w_ref[...], preferred_element_type=jnp.float32)   # (T, E)
    T, E = y.shape
    tp = T // batch
    y = y.reshape(tp, batch, E) + add_ref[...][:, None, :]                    # broadcast over B
    o_ref[...] = y.reshape(T, E)


def _encoder_layer_kernel(x_ref, wqkv_ref, bqkv_ref, wo_ref, bo_ref,
                          ln1g_ref, ln1b_ref, w1_ref, b1_ref, w2_ref, b2_ref,
                          ln2g_ref, ln2b_ref, o_ref, *, num_heads, batch, scale, eps):
    x = x_ref[...]                                    # (T, E), rows ordered (patch, batch)
    T, E = x.shape
    B = batch
    tp = T // B
    H = num_heads
    dh = E // H

    # ---- self-attention (PyTorch batch_first=False: seq axis == B, "batch" == patches)
    qkv = jnp.dot(x, wqkv_ref[...], preferred_element_type=jnp.float32) + bqkv_ref[...]
    q = qkv[:, :E]
    k = qkv[:, E:2 * E]
    v = qkv[:, 2 * E:]

    head_outs = []
    for h in range(H):                                # static unroll over heads
        sl = slice(h * dh, (h + 1) * dh)
        qh = (q[:, sl] * scale).reshape(tp, B, dh)
        kh = k[:, sl].reshape(tp, B, dh)
        vh = v[:, sl].reshape(tp, B, dh)
        # MXU batched matmuls (no broadcast-multiply-reduce intermediates)
        s = jnp.einsum("pld,pmd->plm", qh, kh,
                       preferred_element_type=jnp.float32)            # (tp, B, B)
        s = s - jnp.max(s, axis=-1, keepdims=True)
        e = jnp.exp(s)
        p = e * pl.reciprocal(jnp.sum(e, axis=-1, keepdims=True), approx=True)
        oh = jnp.einsum("plm,pmd->pld", p, vh,
                        preferred_element_type=jnp.float32)            # (tp, B, dh)
        head_outs.append(oh.reshape(T, dh))
    ao = jnp.concatenate(head_outs, axis=-1)                            # (T, E), head order
    ao = jnp.dot(ao, wo_ref[...], preferred_element_type=jnp.float32) + bo_ref[...]

    # ---- residual + LayerNorm 1 (post-norm, eps=1e-5)
    h1 = x + ao
    mu = jnp.mean(h1, axis=-1, keepdims=True)
    d = h1 - mu
    var = jnp.mean(d * d, axis=-1, keepdims=True)
    h1 = d * jax.lax.rsqrt(var + eps) * ln1g_ref[...] + ln1b_ref[...]

    # ---- feed-forward: Linear -> ReLU -> Linear (dropout = identity)
    f = jnp.dot(h1, w1_ref[...], preferred_element_type=jnp.float32) + b1_ref[...]
    f = jnp.maximum(f, 0.0)
    f = jnp.dot(f, w2_ref[...], preferred_element_type=jnp.float32) + b2_ref[...]

    # ---- residual + LayerNorm 2
    h2 = h1 + f
    mu = jnp.mean(h2, axis=-1, keepdims=True)
    d = h2 - mu
    var = jnp.mean(d * d, axis=-1, keepdims=True)
    o_ref[...] = d * jax.lax.rsqrt(var + eps) * ln2g_ref[...] + ln2b_ref[...]


def _pool_fc_kernel(x_ref, w_ref, b_ref, o_ref, acc_ref, *, batch, inv_p):
    @pl.when(pl.program_id(0) == 0)
    def _():
        acc_ref[...] = jnp.zeros_like(acc_ref)

    x = x_ref[...]                                    # (tp*B, E)
    T, E = x.shape
    tp = T // batch
    acc_ref[...] += jnp.sum(x.reshape(tp, batch, E), axis=0)

    @pl.when(pl.program_id(0) == pl.num_programs(0) - 1)
    def _():
        pooled = acc_ref[...] * inv_p                 # mean over patches, (B, E)
        o_ref[...] = jnp.dot(pooled, w_ref[...],
                             preferred_element_type=jnp.float32) + b_ref[...]


# ----------------------------- wrappers -----------------------------

def _choose_patch_tile(num_patches, batch, embed_dim, budget_bytes=2 << 20):
    # Whole token slab fits comfortably -> single tile (grid collapses to one step).
    if num_patches * batch * embed_dim * 4 <= budget_bytes:
        return num_patches
    # Otherwise: largest patch tile dividing P whose token block keeps the sublane dim
    # a multiple of 8 and fits the per-buffer VMEM budget (double-buffered by Pallas).
    for tp in range(num_patches, 0, -1):
        if (num_patches % tp == 0 and tp % 8 == 0
                and tp * batch * embed_dim * 4 <= budget_bytes):
            return tp
    return num_patches


def patch_embed(patches, conv_wt, add, *, batch, patch_tile):
    T, Cpp = patches.shape
    E = conv_wt.shape[1]
    P = T // batch
    tp = patch_tile
    kern = functools.partial(_patch_embed_kernel, batch=batch)
    return pl.pallas_call(
        kern,
        out_shape=jax.ShapeDtypeStruct((T, E), jnp.float32),
        grid=(P // tp,),
        in_specs=[
            pl.BlockSpec((tp * batch, Cpp), lambda i: (i, 0)),
            pl.BlockSpec((Cpp, E), lambda i: (0, 0)),
            pl.BlockSpec((tp, E), lambda i: (i, 0)),
        ],
        out_specs=pl.BlockSpec((tp * batch, E), lambda i: (i, 0)),
        compiler_params=pltpu.CompilerParams(dimension_semantics=("parallel",)),
    )(patches, conv_wt, add)


def encoder_layer(xf, layer, *, batch, num_heads, patch_tile):
    T, E = xf.shape
    P = T // batch
    tp = patch_tile
    dh = E // num_heads
    kern = functools.partial(_encoder_layer_kernel, num_heads=num_heads, batch=batch,
                             scale=1.0 / (dh ** 0.5), eps=1e-5)
    tok = pl.BlockSpec((tp * batch, E), lambda i: (i, 0))

    def full(arr):
        shape = arr.shape
        return pl.BlockSpec(shape, lambda i: (0,) * len(shape))

    return pl.pallas_call(
        kern,
        out_shape=jax.ShapeDtypeStruct((T, E), jnp.float32),
        grid=(P // tp,),
        in_specs=[
            tok,
            full(layer["wqkv"]), full(layer["bqkv"]),
            full(layer["wo"]), full(layer["bo"]),
            full(layer["ln1_g"]), full(layer["ln1_b"]),
            full(layer["w1"]), full(layer["b1"]),
            full(layer["w2"]), full(layer["b2"]),
            full(layer["ln2_g"]), full(layer["ln2_b"]),
        ],
        out_specs=tok,
        compiler_params=pltpu.CompilerParams(dimension_semantics=("parallel",)),
    )(xf, layer["wqkv"], layer["bqkv"], layer["wo"], layer["bo"],
      layer["ln1_g"], layer["ln1_b"], layer["w1"], layer["b1"],
      layer["w2"], layer["b2"], layer["ln2_g"], layer["ln2_b"])


def pool_and_fc(xf, fc_wt, fc_b, *, batch, patch_tile):
    T, E = xf.shape
    P = T // batch
    tp = patch_tile
    C = fc_wt.shape[1]
    kern = functools.partial(_pool_fc_kernel, batch=batch, inv_p=1.0 / P)
    return pl.pallas_call(
        kern,
        out_shape=jax.ShapeDtypeStruct((batch, C), jnp.float32),
        grid=(P // tp,),
        in_specs=[
            pl.BlockSpec((tp * batch, E), lambda i: (i, 0)),
            pl.BlockSpec((E, C), lambda i: (0, 0)),
            pl.BlockSpec((1, C), lambda i: (0, 0)),
        ],
        out_specs=pl.BlockSpec((batch, C), lambda i: (0, 0)),
        scratch_shapes=[pltpu.VMEM((batch, E), jnp.float32)],
        compiler_params=pltpu.CompilerParams(dimension_semantics=("arbitrary",)),
    )(xf, fc_wt, fc_b)


# ----------------------------- parameters -----------------------------

def init_params(key, *, embed_dim, patch_size, num_patches, num_layers, num_classes):
    E = embed_dim
    ps = patch_size
    keys = iter(jax.random.split(key, 16 + 16 * num_layers))

    def rnd(shape, scale=0.02):
        return (scale * jax.random.normal(next(keys), shape)).astype(jnp.float32)

    # All weights stored pre-transposed ((in, out) layout) -> no per-call transposes.
    params = {
        "conv_wt": rnd((3 * ps * ps, E)),       # Conv2d(3,E,ps,stride=ps).weight, flat + .T
        "conv_b":  rnd((E,)),
        "pos":     rnd((num_patches, E)),       # positional_embeddings (squeezed)
        "fc_wt":   rnd((E, num_classes)),       # fc_out.weight.T
        "fc_b":    rnd((1, num_classes)),
        "layers":  [],
    }
    for _ in range(num_layers):
        params["layers"].append({
            "wqkv": rnd((E, 3 * E)),            # in_proj_weight.T
            "bqkv": rnd((1, 3 * E)),
            "wo":   rnd((E, E)),                # out_proj.weight.T
            "bo":   rnd((1, E)),
            "w1":   rnd((E, 4 * E)),            # linear1.weight.T
            "b1":   rnd((1, 4 * E)),
            "w2":   rnd((4 * E, E)),            # linear2.weight.T
            "b2":   rnd((1, E)),
            "ln1_g": jnp.ones((1, E), jnp.float32),
            "ln1_b": jnp.zeros((1, E), jnp.float32),
            "ln2_g": jnp.ones((1, E), jnp.float32),
            "ln2_b": jnp.zeros((1, E), jnp.float32),
        })
    return params


# ----------------------------- forward pass -----------------------------

def vit_forward(params, x, *, patch_size, num_heads):
    B, C, Himg, Wimg = x.shape
    ps = patch_size
    Hp, Wp = Himg // ps, Wimg // ps
    P = Hp * Wp
    Cpp = C * ps * ps
    E = params["conv_wt"].shape[1]
    tp = _choose_patch_tile(P, B, E)

    # strided Conv2d == patch unfold + matmul; tokens laid out (patch, batch) so each
    # patch's attention "sequence" (the batch axis, batch_first=False quirk) is contiguous.
    patches = (
        x.reshape(B, C, Hp, ps, Wp, ps)
         .transpose(2, 4, 0, 1, 3, 5)              # (Hp, Wp, B, C, ps, ps)
         .reshape(P * B, Cpp)
    ).astype(jnp.float32)

    # conv bias + positional embedding folded into one (P, E) additive term.
    add = params["pos"] + params["conv_b"][None, :]

    xf = patch_embed(patches, params["conv_wt"], add, batch=B, patch_tile=tp)

    # fused transformer encoder layers (one pallas_call each; activations stay in VMEM)
    for layer in params["layers"]:
        xf = encoder_layer(xf, layer, batch=B, num_heads=num_heads, patch_tile=tp)

    # mean over patches (dim=1 of (B, P, E)) + classifier head, fused
    return pool_and_fc(xf, params["fc_wt"], params["fc_b"], batch=B, patch_tile=tp)


# ----------------------------- main -----------------------------

if __name__ == "__main__":
    key = jax.random.PRNGKey(0)
    pkey, xkey = jax.random.split(key)

    # small shapes consistent with the module's forward
    image_size, patch_size = 32, 16
    embed_dim, num_heads, num_layers, num_classes = 32, 4, 2, 16
    batch = 2
    num_patches = (image_size // patch_size) ** 2          # 4

    params = init_params(
        pkey,
        embed_dim=embed_dim,
        patch_size=patch_size,
        num_patches=num_patches,
        num_layers=num_layers,
        num_classes=num_classes,
    )
    x = jax.random.normal(xkey, (batch, 3, image_size, image_size), jnp.float32)

    fwd = jax.jit(functools.partial(vit_forward, patch_size=patch_size, num_heads=num_heads))
    out = jax.block_until_ready(fwd(params, x))
    assert out.shape == (batch, num_classes)
    assert bool(jnp.all(jnp.isfinite(out)))
    print("KERNEL_OK")
</pallas_src>

<mosaic_0001>
module attributes {stable_mosaic.version = 11 : i64} {
  func.func @_patch_embed_kernel(%arg0: i32, %arg1: memref<8x768xf32, #tpu.memory_space<vmem>>, %arg2: memref<768x32xf32, #tpu.memory_space<vmem>>, %arg3: memref<4x32xf32, #tpu.memory_space<vmem>>, %arg4: memref<8x32xf32, #tpu.memory_space<vmem>>) attributes {dimension_semantics = [#tpu.dimension_semantics<parallel>], iteration_bounds = array<i64: 1>, scalar_prefetch = 0 : i64, scratch_operands = 0 : i64, tpu.core_type = #tpu.core_type<tc>, window_params = [{transform_indices = @transform_0, window_bounds = array<i64: 8, 768>}, {pipeline_mode = #tpu.pipeline_mode<synchronous>, transform_indices = @transform_1, window_bounds = array<i64: 768, 32>}, {transform_indices = @transform_2, window_bounds = array<i64: 4, 32>}, {transform_indices = @transform_3, window_bounds = array<i64: 8, 32>}]} {
    %c0 = arith.constant 0 : index
    %c0_0 = arith.constant 0 : index
    %0 = vector.load %arg1[%c0, %c0_0] : memref<8x768xf32, #tpu.memory_space<vmem>>, vector<8x768xf32>
    %c0_1 = arith.constant 0 : index
    %c0_2 = arith.constant 0 : index
    %1 = vector.load %arg2[%c0_1, %c0_2] : memref<768x32xf32, #tpu.memory_space<vmem>>, vector<768x32xf32>
    %cst = arith.constant dense<0.000000e+00> : vector<8x32xf32>
    %2 = tpu.matmul %0, %1, %cst {dimension_numbers = #tpu.dot_dimension_numbers<[1], [0], [0], [1], [0, 0, 1, 1], [], []>} : vector<8x768xf32>, vector<768x32xf32>, vector<8x32xf32> -> vector<8x32xf32>
    %3 = vector.shape_cast %2 : vector<8x32xf32> to vector<4x2x32xf32>
    %c0_3 = arith.constant 0 : index
    %c0_4 = arith.constant 0 : index
    %4 = vector.load %arg3[%c0_3, %c0_4] : memref<4x32xf32, #tpu.memory_space<vmem>>, vector<4x32xf32>
    %5 = vector.shape_cast %4 : vector<4x32xf32> to vector<4x1x32xf32>
    %6 = vector.broadcast %5 : vector<4x1x32xf32> to vector<4x2x32xf32>
    %7 = arith.addf %3, %6 : vector<4x2x32xf32>
    %8 = vector.shape_cast %7 : vector<4x2x32xf32> to vector<8x32xf32>
    %c0_5 = arith.constant 0 : index
    %c0_6 = arith.constant 0 : index
    %9 = vector.load %arg4[%c0_5, %c0_6] : memref<8x32xf32, #tpu.memory_space<vmem>>, vector<8x32xf32>
    tpu.vector_store %arg4[%c0_5, %c0_6], %8 {strides = array<i32>} : memref<8x32xf32, #tpu.memory_space<vmem>>, vector<8x32xf32>,
    return
  }
  func.func @transform_0(%arg0: i32) -> (i32, i32) {
    %c0_i32 = arith.constant 0 : i32
    %c0_i32_0 = arith.constant 0 : i32
    return %arg0, %c0_i32 : i32, i32
  }
  func.func @transform_1(%arg0: i32) -> (i32, i32) {
    %c0_i32 = arith.constant 0 : i32
    %c0_i32_0 = arith.constant 0 : i32
    %c0_i32_1 = arith.constant 0 : i32
    return %c0_i32, %c0_i32_0 : i32, i32
  }
  func.func @transform_2(%arg0: i32) -> (i32, i32) {
    %c0_i32 = arith.constant 0 : i32
    %c0_i32_0 = arith.constant 0 : i32
    return %arg0, %c0_i32 : i32, i32
  }
  func.func @transform_3(%arg0: i32) -> (i32, i32) {
    %c0_i32 = arith.constant 0 : i32
    %c0_i32_0 = arith.constant 0 : i32
    return %arg0, %c0_i32 : i32, i32
  }
}

module attributes {stable_mosaic.version = 11 : i64} {
  func.func @_encoder_layer_kernel(%arg0: i32, %arg1: memref<8x32xf32, #tpu.memory_space<vmem>>, %arg2: memref<32x96xf32, #tpu.memory_space<vmem>>, %arg3: memref<1x96xf32, #tpu.memory_space<vmem>>, %arg4: memref<32x32xf32, #tpu.memory_space<vmem>>, %arg5: memref<1x32xf32, #tpu.memory_space<vmem>>, %arg6: memref<1x32xf32, #tpu.memory_space<vmem>>, %arg7: memref<1x32xf32, #tpu.memory_space<vmem>>, %arg8: memref<32x128xf32, #tpu.memory_space<vmem>>, %arg9: memref<1x128xf32, #tpu.memory_space<vmem>>, %arg10: memref<128x32xf32, #tpu.memory_space<vmem>>, %arg11: memref<1x32xf32, #tpu.memory_space<vmem>>, %arg12: memref<1x32xf32, #tpu.memory_space<vmem>>, %arg13: memref<1x32xf32, #tpu.memory_space<vmem>>, %arg14: memref<8x32xf32, #tpu.memory_space<vmem>>) attributes {dimension_semantics = [#tpu.dimension_semantics<parallel>], iteration_bounds = array<i64: 1>, scalar_prefetch = 0 : i64, scratch_operands = 0 : i64, tpu.core_type = #tpu.core_type<tc>, window_params = [{transform_indices = @transform_0, window_bounds = array<i64: 8, 32>}, {pipeline_mode = #tpu.pipeline_mode<synchronous>, transform_indices = @transform_1, window_bounds = array<i64: 32, 96>}, {pipeline_mode = #tpu.pipeline_mode<synchronous>, transform_indices = @transform_2, window_bounds = array<i64: 1, 96>}, {pipeline_mode = #tpu.pipeline_mode<synchronous>, transform_indices = @transform_3, window_bounds = array<i64: 32, 32>}, {pipeline_mode = #tpu.pipeline_mode<synchronous>, transform_indices = @transform_4, window_bounds = array<i64: 1, 32>}, {pipeline_mode = #tpu.pipeline_mode<synchronous>, transform_indices = @transform_5, window_bounds = array<i64: 1, 32>}, {pipeline_mode = #tpu.pipeline_mode<synchronous>, transform_indices = @transform_6, window_bounds = array<i64: 1, 32>}, {pipeline_mode = #tpu.pipeline_mode<synchronous>, transform_indices = @transform_7, window_bounds = array<i64: 32, 128>}, {pipeline_mode = #tpu.pipeline_mode<synchronous>, transform_indices = @transform_8, window_bounds = array<i64: 1, 128>}, {pipeline_mode = #tpu.pipeline_mode<synchronous>, transform_indices = @transform_9, window_bounds = array<i64: 128, 32>}, {pipeline_mode = #tpu.pipeline_mode<synchronous>, transform_indices = @transform_10, window_bounds = array<i64: 1, 32>}, {pipeline_mode = #tpu.pipeline_mode<synchronous>, transform_indices = @transform_11, window_bounds = array<i64: 1, 32>}, {pipeline_mode = #tpu.pipeline_mode<synchronous>, transform_indices = @transform_12, window_bounds = array<i64: 1, 32>}, {transform_indices = @transform_13, window_bounds = array<i64: 8, 32>}]} {
    %c0 = arith.constant 0 : index
    %c0_0 = arith.constant 0 : index
    %0 = vector.load %arg1[%c0, %c0_0] : memref<8x32xf32, #tpu.memory_space<vmem>>, vector<8x32xf32>
    %c0_1 = arith.constant 0 : index
    %c0_2 = arith.constant 0 : index
    %1 = vector.load %arg2[%c0_1, %c0_2] : memref<32x96xf32, #tpu.memory_space<vmem>>, vector<32x96xf32>
    %cst = arith.constant dense<0.000000e+00> : vector<8x96xf32>
    %2 = tpu.matmul %0, %1, %cst {dimension_numbers = #tpu.dot_dimension_numbers<[1], [0], [0], [1], [0, 0, 1, 1], [], []>} : vector<8x32xf32>, vector<32x96xf32>, vector<8x96xf32> -> vector<8x96xf32>
    %c0_3 = arith.constant 0 : index
    %c0_4 = arith.constant 0 : index
    %3 = vector.load %arg3[%c0_3, %c0_4] : memref<1x96xf32, #tpu.memory_space<vmem>>, vector<1x96xf32>
    %4 = vector.broadcast %3 : vector<1x96xf32> to vector<8x96xf32>
    %5 = arith.addf %2, %4 : vector<8x96xf32>
    %6 = vector.extract_strided_slice %5 {offsets = [0, 0], sizes = [8, 32], strides = [1, 1]} : vector<8x96xf32> to vector<8x32xf32>
    %7 = vector.extract_strided_slice %5 {offsets = [0, 32], sizes = [8, 32], strides = [1, 1]} : vector<8x96xf32> to vector<8x32xf32>
    %8 = vector.extract_strided_slice %5 {offsets = [0, 64], sizes = [8, 32], strides = [1, 1]} : vector<8x96xf32> to vector<8x32xf32>
    %9 = vector.extract_strided_slice %6 {offsets = [0, 0], sizes = [8, 8], strides = [1, 1]} : vector<8x32xf32> to vector<8x8xf32>
    %cst_5 = arith.constant 0.353553385 : f32
    %10 = vector.broadcast %cst_5 : f32 to vector<8x8xf32>
    %11 = arith.mulf %9, %10 : vector<8x8xf32>
    %12 = vector.shape_cast %11 : vector<8x8xf32> to vector<4x2x8xf32>
    %13 = vector.extract_strided_slice %7 {offsets = [0, 0], sizes = [8, 8], strides = [1, 1]} : vector<8x32xf32> to vector<8x8xf32>
    %14 = vector.shape_cast %13 : vector<8x8xf32> to vector<4x2x8xf32>
    %15 = vector.extract_strided_slice %8 {offsets = [0, 0], sizes = [8, 8], strides = [1, 1]} : vector<8x32xf32> to vector<8x8xf32>
    %16 = vector.shape_cast %15 : vector<8x8xf32> to vector<4x2x8xf32>
    "tpu.trace_start"() <{level = 10 : i32, message = "pld,pmd->plm"}> : () -> ()
    %cst_6 = arith.constant dense<0.000000e+00> : vector<4x2x2xf32>
    %17 = tpu.matmul %12, %14, %cst_6 {dimension_numbers = #tpu.dot_dimension_numbers<[2], [2], [1], [1], [0, 0, 0, 1, 1, 1], [0], [0]>} : vector<4x2x8xf32>, vector<4x2x8xf32>, vector<4x2x2xf32> -> vector<4x2x2xf32>
    "tpu.trace_stop"() : () -> ()
    %cst_7 = arith.constant dense<0xFF800000> : vector<4x2xf32>
    %18 = vector.multi_reduction <maximumf>, %17, %cst_7 [2] : vector<4x2x2xf32> to vector<4x2xf32>
    %19 = vector.shape_cast %18 : vector<4x2xf32> to vector<4x2x1xf32>
    %20 = vector.broadcast %19 : vector<4x2x1xf32> to vector<4x2x2xf32>
    %21 = arith.subf %17, %20 : vector<4x2x2xf32>
    %22 = math.exp %21 : vector<4x2x2xf32>
    %cst_8 = arith.constant dense<0.000000e+00> : vector<4x2xf32>
    %23 = vector.multi_reduction <add>, %22, %cst_8 [2] : vector<4x2x2xf32> to vector<4x2xf32>
    %24 = vector.shape_cast %23 : vector<4x2xf32> to vector<4x2x1xf32>
    %25 = tpu.reciprocal %24 {approx = true} : vector<4x2x1xf32> -> vector<4x2x1xf32>
    %26 = vector.broadcast %25 : vector<4x2x1xf32> to vector<4x2x2xf32>
    %27 = arith.mulf %22, %26 : vector<4x2x2xf32>
    "tpu.trace_start"() <{level = 10 : i32, message = "plm,pmd->pld"}> : () -> ()
    %cst_9 = arith.constant dense<0.000000e+00> : vector<4x2x8xf32>
    %28 = tpu.matmul %27, %16, %cst_9 {dimension_numbers = #tpu.dot_dimension_numbers<[2], [1], [1], [2], [0, 0, 0, 1, 1, 2], [0], [0]>} : vector<4x2x2xf32>, vector<4x2x8xf32>, vector<4x2x8xf32> -> vector<4x2x8xf32>
    "tpu.trace_stop"() : () -> ()
    %29 = vector.shape_cast %28 : vector<4x2x8xf32> to vector<8x8xf32>
    %30 = vector.extract_strided_slice %6 {offsets = [0, 8], sizes = [8, 8], strides = [1, 1]} : vector<8x32xf32> to vector<8x8xf32>
    %cst_10 = arith.constant 0.353553385 : f32
    %31 = vector.broadcast %cst_10 : f32 to vector<8x8xf32>
    %32 = arith.mulf %30, %31 : vector<8x8xf32>
    %33 = vector.shape_cast %32 : vector<8x8xf32> to vector<4x2x8xf32>
    %34 = vector.extract_strided_slice %7 {offsets = [0, 8], sizes = [8, 8], strides = [1, 1]} : vector<8x32xf32> to vector<8x8xf32>
    %35 = vector.shape_cast %34 : vector<8x8xf32> to vector<4x2x8xf32>
    %36 = vector.extract_strided_slice %8 {offsets = [0, 8], sizes = [8, 8], strides = [1, 1]} : vector<8x32xf32> to vector<8x8xf32>
    %37 = vector.shape_cast %36 : vector<8x8xf32> to vector<4x2x8xf32>
    "tpu.trace_start"() <{level = 10 : i32, message = "pld,pmd->plm"}> : () -> ()
    %cst_11 = arith.constant dense<0.000000e+00> : vector<4x2x2xf32>
    %38 = tpu.matmul %33, %35, %cst_11 {dimension_numbers = #tpu.dot_dimension_numbers<[2], [2], [1], [1], [0, 0, 0, 1, 1, 1], [0], [0]>} : vector<4x2x8xf32>, vector<4x2x8xf32>, vector<4x2x2xf32> -> vector<4x2x2xf32>
    "tpu.trace_stop"() : () -> ()
    %cst_12 = arith.constant dense<0xFF800000> : vector<4x2xf32>
    %39 = vector.multi_reduction <maximumf>, %38, %cst_12 [2] : vector<4x2x2xf32> to vector<4x2xf32>
    %40 = vector.shape_cast %39 : vector<4x2xf32> to vector<4x2x1xf32>
    %41 = vector.broadcast %40 : vector<4x2x1xf32> to vector<4x2x2xf32>
    %42 = arith.subf %38, %41 : vector<4x2x2xf32>
    %43 = math.exp %42 : vector<4x2x2xf32>
    %cst_13 = arith.constant dense<0.000000e+00> : vector<4x2xf32>
    %44 = vector.multi_reduction <add>, %43, %cst_13 [2] : vector<4x2x2xf32> to vector<4x2xf32>
    %45 = vector.shape_cast %44 : vector<4x2xf32> to vector<4x2x1xf32>
    %46 = tpu.reciprocal %45 {approx = true} : vector<4x2x1xf32> -> vector<4x2x1xf32>
    %47 = vector.broadcast %46 : vector<4x2x1xf32> to vector<4x2x2xf32>
    %48 = arith.mulf %43, %47 : vector<4x2x2xf32>
    "tpu.trace_start"() <{level = 10 : i32, message = "plm,pmd->pld"}> : () -> ()
    %cst_14 = arith.constant dense<0.000000e+00> : vector<4x2x8xf32>
    %49 = tpu.matmul %48, %37, %cst_14 {dimension_numbers = #tpu.dot_dimension_numbers<[2], [1], [1], [2], [0, 0, 0, 1, 1, 2], [0], [0]>} : vector<4x2x2xf32>, vector<4x2x8xf32>, vector<4x2x8xf32> -> vector<4x2x8xf32>
    "tpu.trace_stop"() : () -> ()
    %50 = vector.shape_cast %49 : vector<4x2x8xf32> to vector<8x8xf32>
    %51 = vector.extract_strided_slice %6 {offsets = [0, 16], sizes = [8, 8], strides = [1, 1]} : vector<8x32xf32> to vector<8x8xf32>
    %cst_15 = arith.constant 0.353553385 : f32
    %52 = vector.broadcast %cst_15 : f32 to vector<8x8xf32>
    %53 = arith.mulf %51, %52 : vector<8x8xf32>
    %54 = vector.shape_cast %53 : vector<8x8xf32> to vector<4x2x8xf32>
    %55 = vector.extract_strided_slice %7 {offsets = [0, 16], sizes = [8, 8], strides = [1, 1]} : vector<8x32xf32> to vector<8x8xf32>
    %56 = vector.shape_cast %55 : vector<8x8xf32> to vector<4x2x8xf32>
    %57 = vector.extract_strided_slice %8 {offsets = [0, 16], sizes = [8, 8], strides = [1, 1]} : vector<8x32xf32> to vector<8x8xf32>
    %58 = vector.shape_cast %57 : vector<8x8xf32> to vector<4x2x8xf32>
    "tpu.trace_start"() <{level = 10 : i32, message = "pld,pmd->plm"}> : () -> ()
    %cst_16 = arith.constant dense<0.000000e+00> : vector<4x2x2xf32>
    %59 = tpu.matmul %54, %56, %cst_16 {dimension_numbers = #tpu.dot_dimension_numbers<[2], [2], [1], [1], [0, 0, 0, 1, 1, 1], [0], [0]>} : vector<4x2x8xf32>, vector<4x2x8xf32>, vector<4x2x2xf32> -> vector<4x2x2xf32>
    "tpu.trace_stop"() : () -> ()
    %cst_17 = arith.constant dense<0xFF800000> : vector<4x2xf32>
    %60 = vector.multi_reduction <maximumf>, %59, %cst_17 [2] : vector<4x2x2xf32> to vector<4x2xf32>
    %61 = vector.shape_cast %60 : vector<4x2xf32> to vector<4x2x1xf32>
    %62 = vector.broadcast %61 : vector<4x2x1xf32> to vector<4x2x2xf32>
    %63 = arith.subf %59, %62 : vector<4x2x2xf32>
    %64 = math.exp %63 : vector<4x2x2xf32>
    %cst_18 = arith.constant dense<0.000000e+00> : vector<4x2xf32>
    %65 = vector.multi_reduction <add>, %64, %cst_18 [2] : vector<4x2x2xf32> to vector<4x2xf32>
    %66 = vector.shape_cast %65 : vector<4x2xf32> to vector<4x2x1xf32>
    %67 = tpu.reciprocal %66 {approx = true} : vector<4x2x1xf32> -> vector<4x2x1xf32>
    %68 = vector.broadcast %67 : vector<4x2x1xf32> to vector<4x2x2xf32>
    %69 = arith.mulf %64, %68 : vector<4x2x2xf32>
    "tpu.trace_start"() <{level = 10 : i32, message = "plm,pmd->pld"}> : () -> ()
    %cst_19 = arith.constant dense<0.000000e+00> : vector<4x2x8xf32>
    %70 = tpu.matmul %69, %58, %cst_19 {dimension_numbers = #tpu.dot_dimension_numbers<[2], [1], [1], [2], [0, 0, 0, 1, 1, 2], [0], [0]>} : vector<4x2x2xf32>, vector<4x2x8xf32>, vector<4x2x8xf32> -> vector<4x2x8xf32>
    "tpu.trace_stop"() : () -> ()
    %71 = vector.shape_cast %70 : vector<4x2x8xf32> to vector<8x8xf32>
    %72 = vector.extract_strided_slice %6 {offsets = [0, 24], sizes = [8, 8], strides = [1, 1]} : vector<8x32xf32> to vector<8x8xf32>
    %cst_20 = arith.constant 0.353553385 : f32
    %73 = vector.broadcast %cst_20 : f32 to vector<8x8xf32>
    %74 = arith.mulf %72, %73 : vector<8x8xf32>
    %75 = vector.shape_cast %74 : vector<8x8xf32> to vector<4x2x8xf32>
    %76 = vector.extract_strided_slice %7 {offsets = [0, 24], sizes = [8, 8], strides = [1, 1]} : vector<8x32xf32> to vector<8x8xf32>
    %77 = vector.shape_cast %76 : vector<8x8xf32> to vector<4x2x8xf32>
    %78 = vector.extract_strided_slice %8 {offsets = [0, 24], sizes = [8, 8], strides = [1, 1]} : vector<8x32xf32> to vector<8x8xf32>
    %79 = vector.shape_cast %78 : vector<8x8xf32> to vector<4x2x8xf32>
    "tpu.trace_start"() <{level = 10 : i32, message = "pld,pmd->plm"}> : () -> ()
    %cst_21 = arith.constant dense<0.000000e+00> : vector<4x2x2xf32>
    %80 = tpu.matmul %75, %77, %cst_21 {dimension_numbers = #tpu.dot_dimension_numbers<[2], [2], [1], [1], [0, 0, 0, 1, 1, 1], [0], [0]>} : vector<4x2x8xf32>, vector<4x2x8xf32>, vector<4x2x2xf32> -> vector<4x2x2xf32>
    "tpu.trace_stop"() : () -> ()
    %cst_22 = arith.constant dense<0xFF800000> : vector<4x2xf32>
    %81 = vector.multi_reduction <maximumf>, %80, %cst_22 [2] : vector<4x2x2xf32> to vector<4x2xf32>
    %82 = vector.shape_cast %81 : vector<4x2xf32> to vector<4x2x1xf32>
    %83 = vector.broadcast %82 : vector<4x2x1xf32> to vector<4x2x2xf32>
    %84 = arith.subf %80, %83 : vector<4x2x2xf32>
    %85 = math.exp %84 : vector<4x2x2xf32>
    %cst_23 = arith.constant dense<0.000000e+00> : vector<4x2xf32>
    %86 = vector.multi_reduction <add>, %85, %cst_23 [2] : vector<4x2x2xf32> to vector<4x2xf32>
    %87 = vector.shape_cast %86 : vector<4x2xf32> to vector<4x2x1xf32>
    %88 = tpu.reciprocal %87 {approx = true} : vector<4x2x1xf32> -> vector<4x2x1xf32>
    %89 = vector.broadcast %88 : vector<4x2x1xf32> to vector<4x2x2xf32>
    %90 = arith.mulf %85, %89 : vector<4x2x2xf32>
    "tpu.trace_start"() <{level = 10 : i32, message = "plm,pmd->pld"}> : () -> ()
    %cst_24 = arith.constant dense<0.000000e+00> : vector<4x2x8xf32>
    %91 = tpu.matmul %90, %79, %cst_24 {dimension_numbers = #tpu.dot_dimension_numbers<[2], [1], [1], [2], [0, 0, 0, 1, 1, 2], [0], [0]>} : vector<4x2x2xf32>, vector<4x2x8xf32>, vector<4x2x8xf32> -> vector<4x2x8xf32>
    "tpu.trace_stop"() : () -> ()
    %92 = vector.shape_cast %91 : vector<4x2x8xf32> to vector<8x8xf32>
    %93 = tpu.concatenate %29, %50, %71, %92 in 1 : vector<8x8xf32>, vector<8x8xf32>, vector<8x8xf32>, vector<8x8xf32> -> vector<8x32xf32>
    %c0_25 = arith.constant 0 : index
    %c0_26 = arith.constant 0 : index
    %94 = vector.load %arg4[%c0_25, %c0_26] : memref<32x32xf32, #tpu.memory_space<vmem>>, vector<32x32xf32>
    %cst_27 = arith.constant dense<0.000000e+00> : vector<8x32xf32>
    %95 = tpu.matmul %93, %94, %cst_27 {dimension_numbers = #tpu.dot_dimension_numbers<[1], [0], [0], [1], [0, 0, 1, 1], [], []>} : vector<8x32xf32>, vector<32x32xf32>, vector<8x32xf32> -> vector<8x32xf32>
    %c0_28 = arith.constant 0 : index
    %c0_29 = arith.constant 0 : index
    %96 = vector.load %arg5[%c0_28, %c0_29] : memref<1x32xf32, #tpu.memory_space<vmem>>, vector<1x32xf32>
    %97 = vector.broadcast %96 : vector<1x32xf32> to vector<8x32xf32>
    %98 = arith.addf %95, %97 : vector<8x32xf32>
    %99 = arith.addf %0, %98 : vector<8x32xf32>
    %cst_30 = arith.constant dense<0.000000e+00> : vector<8xf32>
    %100 = vector.multi_reduction <add>, %99, %cst_30 [1] : vector<8x32xf32> to vector<8xf32>
    %101 = vector.shape_cast %100 : vector<8xf32> to vector<8x1xf32>
    %cst_31 = arith.constant 3.200000e+01 : f32
    %102 = vector.broadcast %cst_31 : f32 to vector<8x1xf32>
    %103 = arith.divf %101, %102 : vector<8x1xf32>
    %104 = vector.broadcast %103 : vector<8x1xf32> to vector<8x32xf32>
    %105 = arith.subf %99, %104 : vector<8x32xf32>
    %106 = arith.mulf %105, %105 : vector<8x32xf32>
    %cst_32 = arith.constant dense<0.000000e+00> : vector<8xf32>
    %107 = vector.multi_reduction <add>, %106, %cst_32 [1] : vector<8x32xf32> to vector<8xf32>
    %108 = vector.shape_cast %107 : vector<8xf32> to vector<8x1xf32>
    %cst_33 = arith.constant 3.200000e+01 : f32
    %109 = vector.broadcast %cst_33 : f32 to vector<8x1xf32>
    %110 = arith.divf %108, %109 : vector<8x1xf32>
    %cst_34 = arith.constant 9.99999974E-6 : f32
    %111 = vector.broadcast %cst_34 : f32 to vector<8x1xf32>
    %112 = arith.addf %110, %111 : vector<8x1xf32>
    %113 = math.rsqrt %112 : vector<8x1xf32>
    %114 = vector.broadcast %113 : vector<8x1xf32> to vector<8x32xf32>
    %115 = arith.mulf %105, %114 : vector<8x32xf32>
    %c0_35 = arith.constant 0 : index
    %c0_36 = arith.constant 0 : index
    %116 = vector.load %arg6[%c0_35, %c0_36] : memref<1x32xf32, #tpu.memory_space<vmem>>, vector<1x32xf32>
    %117 = vector.broadcast %116 : vector<1x32xf32> to vector<8x32xf32>
    %118 = arith.mulf %115, %117 : vector<8x32xf32>
    %c0_37 = arith.constant 0 : index
    %c0_38 = arith.constant 0 : index
    %119 = vector.load %arg7[%c0_37, %c0_38] : memref<1x32xf32, #tpu.memory_space<vmem>>, vector<1x32xf32>
    %120 = vector.broadcast %119 : vector<1x32xf32> to vector<8x32xf32>
    %121 = arith.addf %118, %120 : vector<8x32xf32>
    %c0_39 = arith.constant 0 : index
    %c0_40 = arith.constant 0 : index
    %122 = vector.load %arg8[%c0_39, %c0_40] : memref<32x128xf32, #tpu.memory_space<vmem>>, vector<32x128xf32>
    %cst_41 = arith.constant dense<0.000000e+00> : vector<8x128xf32>
    %123 = tpu.matmul %121, %122, %cst_41 {dimension_numbers = #tpu.dot_dimension_numbers<[1], [0], [0], [1], [0, 0, 1, 1], [], []>} : vector<8x32xf32>, vector<32x128xf32>, vector<8x128xf32> -> vector<8x128xf32>
    %c0_42 = arith.constant 0 : index
    %c0_43 = arith.constant 0 : index
    %124 = vector.load %arg9[%c0_42, %c0_43] : memref<1x128xf32, #tpu.memory_space<vmem>>, vector<1x128xf32>
    %125 = vector.broadcast %124 : vector<1x128xf32> to vector<8x128xf32>
    %126 = arith.addf %123, %125 : vector<8x128xf32>
    %cst_44 = arith.constant 0.000000e+00 : f32
    %127 = vector.broadcast %cst_44 : f32 to vector<8x128xf32>
    %128 = arith.maximumf %126, %127 : vector<8x128xf32>
    %c0_45 = arith.constant 0 : index
    %c0_46 = arith.constant 0 : index
    %129 = vector.load %arg10[%c0_45, %c0_46] : memref<128x32xf32, #tpu.memory_space<vmem>>, vector<128x32xf32>
    %cst_47 = arith.constant dense<0.000000e+00> : vector<8x32xf32>
    %130 = tpu.matmul %128, %129, %cst_47 {dimension_numbers = #tpu.dot_dimension_numbers<[1], [0], [0], [1], [0, 0, 1, 1], [], []>} : vector<8x128xf32>, vector<128x32xf32>, vector<8x32xf32> -> vector<8x32xf32>
    %c0_48 = arith.constant 0 : index
    %c0_49 = arith.constant 0 : index
    %131 = vector.load %arg11[%c0_48, %c0_49] : memref<1x32xf32, #tpu.memory_space<vmem>>, vector<1x32xf32>
    %132 = vector.broadcast %131 : vector<1x32xf32> to vector<8x32xf32>
    %133 = arith.addf %130, %132 : vector<8x32xf32>
    %134 = arith.addf %121, %133 : vector<8x32xf32>
    %cst_50 = arith.constant dense<0.000000e+00> : vector<8xf32>
    %135 = vector.multi_reduction <add>, %134, %cst_50 [1] : vector<8x32xf32> to vector<8xf32>
    %136 = vector.shape_cast %135 : vector<8xf32> to vector<8x1xf32>
    %cst_51 = arith.constant 3.200000e+01 : f32
    %137 = vector.broadcast %cst_51 : f32 to vector<8x1xf32>
    %138 = arith.divf %136, %137 : vector<8x1xf32>
    %139 = vector.broadcast %138 : vector<8x1xf32> to vector<8x32xf32>
    %140 = arith.subf %134, %139 : vector<8x32xf32>
    %141 = arith.mulf %140, %140 : vector<8x32xf32>
    %cst_52 = arith.constant dense<0.000000e+00> : vector<8xf32>
    %142 = vector.multi_reduction <add>, %141, %cst_52 [1] : vector<8x32xf32> to vector<8xf32>
    %143 = vector.shape_cast %142 : vector<8xf32> to vector<8x1xf32>
    %cst_53 = arith.constant 3.200000e+01 : f32
    %144 = vector.broadcast %cst_53 : f32 to vector<8x1xf32>
    %145 = arith.divf %143, %144 : vector<8x1xf32>
    %cst_54 = arith.constant 9.99999974E-6 : f32
    %146 = vector.broadcast %cst_54 : f32 to vector<8x1xf32>
    %147 = arith.addf %145, %146 : vector<8x1xf32>
    %148 = math.rsqrt %147 : vector<8x1xf32>
    %149 = vector.broadcast %148 : vector<8x1xf32> to vector<8x32xf32>
    %150 = arith.mulf %140, %149 : vector<8x32xf32>
    %c0_55 = arith.constant 0 : index
    %c0_56 = arith.constant 0 : index
    %151 = vector.load %arg12[%c0_55, %c0_56] : memref<1x32xf32, #tpu.memory_space<vmem>>, vector<1x32xf32>
    %152 = vector.broadcast %151 : vector<1x32xf32> to vector<8x32xf32>
    %153 = arith.mulf %150, %152 : vector<8x32xf32>
    %c0_57 = arith.constant 0 : index
    %c0_58 = arith.constant 0 : index
    %154 = vector.load %arg13[%c0_57, %c0_58] : memref<1x32xf32, #tpu.memory_space<vmem>>, vector<1x32xf32>
    %155 = vector.broadcast %154 : vector<1x32xf32> to vector<8x32xf32>
    %156 = arith.addf %153, %155 : vector<8x32xf32>
    %c0_59 = arith.constant 0 : index
    %c0_60 = arith.constant 0 : index
    %157 = vector.load %arg14[%c0_59, %c0_60] : memref<8x32xf32, #tpu.memory_space<vmem>>, vector<8x32xf32>
    tpu.vector_store %arg14[%c0_59, %c0_60], %156 {strides = array<i32>} : memref<8x32xf32, #tpu.memory_space<vmem>>, vector<8x32xf32>,
    return
  }
  func.func @transform_0(%arg0: i32) -> (i32, i32) {
    %c0_i32 = arith.constant 0 : i32
    %c0_i32_0 = arith.constant 0 : i32
    return %arg0, %c0_i32 : i32, i32
  }
  func.func @transform_1(%arg0: i32) -> (i32, i32) {
    %c0_i32 = arith.constant 0 : i32
    %c0_i32_0 = arith.constant 0 : i32
    %c0_i32_1 = arith.constant 0 : i32
    return %c0_i32, %c0_i32_0 : i32, i32
  }
  func.func @transform_2(%arg0: i32) -> (i32, i32) {
    %c0_i32 = arith.constant 0 : i32
    %c0_i32_0 = arith.constant 0 : i32
    %c0_i32_1 = arith.constant 0 : i32
    return %c0_i32, %c0_i32_0 : i32, i32
  }
  func.func @transform_3(%arg0: i32) -> (i32, i32) {
    %c0_i32 = arith.constant 0 : i32
    %c0_i32_0 = arith.constant 0 : i32
    %c0_i32_1 = arith.constant 0 : i32
    return %c0_i32, %c0_i32_0 : i32, i32
  }
  func.func @transform_4(%arg0: i32) -> (i32, i32) {
    %c0_i32 = arith.constant 0 : i32
    %c0_i32_0 = arith.constant 0 : i32
    %c0_i32_1 = arith.constant 0 : i32
    return %c0_i32, %c0_i32_0 : i32, i32
  }
  func.func @transform_5(%arg0: i32) -> (i32, i32) {
    %c0_i32 = arith.constant 0 : i32
    %c0_i32_0 = arith.constant 0 : i32
    %c0_i32_1 = arith.constant 0 : i32
    return %c0_i32, %c0_i32_0 : i32, i32
  }
  func.func @transform_6(%arg0: i32) -> (i32, i32) {
    %c0_i32 = arith.constant 0 : i32
    %c0_i32_0 = arith.constant 0 : i32
    %c0_i32_1 = arith.constant 0 : i32
    return %c0_i32, %c0_i32_0 : i32, i32
  }
  func.func @transform_7(%arg0: i32) -> (i32, i32) {
    %c0_i32 = arith.constant 0 : i32
    %c0_i32_0 = arith.constant 0 : i32
    %c0_i32_1 = arith.constant 0 : i32
    return %c0_i32, %c0_i32_0 : i32, i32
  }
  func.func @transform_8(%arg0: i32) -> (i32, i32) {
    %c0_i32 = arith.constant 0 : i32
    %c0_i32_0 = arith.constant 0 : i32
    %c0_i32_1 = arith.constant 0 : i32
    return %c0_i32, %c0_i32_0 : i32, i32
  }
  func.func @transform_9(%arg0: i32) -> (i32, i32) {
    %c0_i32 = arith.constant 0 : i32
    %c0_i32_0 = arith.constant 0 : i32
    %c0_i32_1 = arith.constant 0 : i32
    return %c0_i32, %c0_i32_0 : i32, i32
  }
  func.func @transform_10(%arg0: i32) -> (i32, i32) {
    %c0_i32 = arith.constant 0 : i32
    %c0_i32_0 = arith.constant 0 : i32
    %c0_i32_1 = arith.constant 0 : i32
    return %c0_i32, %c0_i32_0 : i32, i32
  }
  func.func @transform_11(%arg0: i32) -> (i32, i32) {
    %c0_i32 = arith.constant 0 : i32
    %c0_i32_0 = arith.constant 0 : i32
    %c0_i32_1 = arith.constant 0 : i32
    return %c0_i32, %c0_i32_0 : i32, i32
  }
  func.func @transform_12(%arg0: i32) -> (i32, i32) {
    %c0_i32 = arith.constant 0 : i32
    %c0_i32_0 = arith.constant 0 : i32
    %c0_i32_1 = arith.constant 0 : i32
    return %c0_i32, %c0_i32_0 : i32, i32
  }
  func.func @transform_13(%arg0: i32) -> (i32, i32) {
    %c0_i32 = arith.constant 0 : i32
    %c0_i32_0 = arith.constant 0 : i32
    return %arg0, %c0_i32 : i32, i32
  }
}

module attributes {stable_mosaic.version = 11 : i64} {
  func.func @_pool_fc_kernel(%arg0: i32, %arg1: memref<8x32xf32, #tpu.memory_space<vmem>>, %arg2: memref<32x16xf32, #tpu.memory_space<vmem>>, %arg3: memref<1x16xf32, #tpu.memory_space<vmem>>, %arg4: memref<2x16xf32, #tpu.memory_space<vmem>>, %arg5: memref<2x32xf32, #tpu.memory_space<vmem>>) attributes {dimension_semantics = [#tpu.dimension_semantics<arbitrary>], iteration_bounds = array<i64: 1>, scalar_prefetch = 0 : i64, scratch_operands = 1 : i64, tpu.core_type = #tpu.core_type<tc>, window_params = [{transform_indices = @transform_0, window_bounds = array<i64: 8, 32>}, {pipeline_mode = #tpu.pipeline_mode<synchronous>, transform_indices = @transform_1, window_bounds = array<i64: 32, 16>}, {pipeline_mode = #tpu.pipeline_mode<synchronous>, transform_indices = @transform_2, window_bounds = array<i64: 1, 16>}, {pipeline_mode = #tpu.pipeline_mode<synchronous>, transform_indices = @transform_3, window_bounds = array<i64: 2, 16>}]} {
    %c0_i32 = arith.constant 0 : i32
    %0 = arith.cmpi eq, %arg0, %c0_i32 : i32
    %1 = arith.extui %0 : i1 to i32
    %c0_i32_0 = arith.constant 0 : i32
    %2 = arith.cmpi ne, %1, %c0_i32_0 : i32
    scf.if %2 {
      %cst_8 = arith.constant 0.000000e+00 : f32
      %12 = vector.broadcast %cst_8 : f32 to vector<2x32xf32>
      %c0_9 = arith.constant 0 : index
      %c0_10 = arith.constant 0 : index
      %13 = vector.load %arg5[%c0_9, %c0_10] : memref<2x32xf32, #tpu.memory_space<vmem>>, vector<2x32xf32>
      tpu.vector_store %arg5[%c0_9, %c0_10], %12 {strides = array<i32>} : memref<2x32xf32, #tpu.memory_space<vmem>>, vector<2x32xf32>,
    } else {
    }
    %c0 = arith.constant 0 : index
    %c0_1 = arith.constant 0 : index
    %3 = vector.load %arg1[%c0, %c0_1] : memref<8x32xf32, #tpu.memory_space<vmem>>, vector<8x32xf32>
    %c0_2 = arith.constant 0 : index
    %c0_3 = arith.constant 0 : index
    %4 = vector.load %arg5[%c0_2, %c0_3] : memref<2x32xf32, #tpu.memory_space<vmem>>, vector<2x32xf32>
    %5 = vector.shape_cast %3 : vector<8x32xf32> to vector<4x2x32xf32>
    %cst = arith.constant dense<0.000000e+00> : vector<2x32xf32>
    %6 = vector.multi_reduction <add>, %5, %cst [0] : vector<4x2x32xf32> to vector<2x32xf32>
    %7 = arith.addf %4, %6 : vector<2x32xf32>
    %c0_4 = arith.constant 0 : index
    %c0_5 = arith.constant 0 : index
    %8 = vector.load %arg5[%c0_4, %c0_5] : memref<2x32xf32, #tpu.memory_space<vmem>>, vector<2x32xf32>
    tpu.vector_store %arg5[%c0_4, %c0_5], %7 {strides = array<i32>} : memref<2x32xf32, #tpu.memory_space<vmem>>, vector<2x32xf32>,
    %c0_i32_6 = arith.constant 0 : i32
    %9 = arith.cmpi eq, %arg0, %c0_i32_6 : i32
    %10 = arith.extui %9 : i1 to i32
    %c0_i32_7 = arith.constant 0 : i32
    %11 = arith.cmpi ne, %10, %c0_i32_7 : i32
    scf.if %11 {
      %c0_8 = arith.constant 0 : index
      %c0_9 = arith.constant 0 : index
      %12 = vector.load %arg5[%c0_8, %c0_9] : memref<2x32xf32, #tpu.memory_space<vmem>>, vector<2x32xf32>
      %cst_10 = arith.constant 2.500000e-01 : f32
      %13 = vector.broadcast %cst_10 : f32 to vector<2x32xf32>
      %14 = arith.mulf %12, %13 : vector<2x32xf32>
      %c0_11 = arith.constant 0 : index
      %c0_12 = arith.constant 0 : index
      %15 = vector.load %arg2[%c0_11, %c0_12] : memref<32x16xf32, #tpu.memory_space<vmem>>, vector<32x16xf32>
      %cst_13 = arith.constant dense<0.000000e+00> : vector<2x16xf32>
      %16 = tpu.matmul %14, %15, %cst_13 {dimension_numbers = #tpu.dot_dimension_numbers<[1], [0], [0], [1], [0, 0, 1, 1], [], []>} : vector<2x32xf32>, vector<32x16xf32>, vector<2x16xf32> -> vector<2x16xf32>
      %c0_14 = arith.constant 0 : index
      %c0_15 = arith.constant 0 : index
      %17 = vector.load %arg3[%c0_14, %c0_15] : memref<1x16xf32, #tpu.memory_space<vmem>>, vector<1x16xf32>
      %18 = vector.broadcast %17 : vector<1x16xf32> to vector<2x16xf32>
      %19 = arith.addf %16, %18 : vector<2x16xf32>
      %c0_16 = arith.constant 0 : index
      %c0_17 = arith.constant 0 : index
      %20 = vector.load %arg4[%c0_16, %c0_17] : memref<2x16xf32, #tpu.memory_space<vmem>>, vector<2x16xf32>
      tpu.vector_store %arg4[%c0_16, %c0_17], %19 {strides = array<i32>} : memref<2x16xf32, #tpu.memory_space<vmem>>, vector<2x16xf32>,
    } else {
    }
    return
  }
  func.func @transform_0(%arg0: i32) -> (i32, i32) {
    %c0_i32 = arith.constant 0 : i32
    %c0_i32_0 = arith.constant 0 : i32
    return %arg0, %c0_i32 : i32, i32
  }
  func.func @transform_1(%arg0: i32) -> (i32, i32) {
    %c0_i32 = arith.constant 0 : i32
    %c0_i32_0 = arith.constant 0 : i32
    %c0_i32_1 = arith.constant 0 : i32
    return %c0_i32, %c0_i32_0 : i32, i32
  }
  func.func @transform_2(%arg0: i32) -> (i32, i32) {
    %c0_i32 = arith.constant 0 : i32
    %c0_i32_0 = arith.constant 0 : i32
    %c0_i32_1 = arith.constant 0 : i32
    return %c0_i32, %c0_i32_0 : i32, i32
  }
  func.func @transform_3(%arg0: i32) -> (i32, i32) {
    %c0_i32 = arith.constant 0 : i32
    %c0_i32_0 = arith.constant 0 : i32
    %c0_i32_1 = arith.constant 0 : i32
    return %c0_i32, %c0_i32_0 : i32, i32
  }
}

</mosaic_0001>

<bundles_post_ra>
// kernel: vit_forward.7
= control target key start
LH: loop header
LB: loop body
LE: loop exit
PB: predicated region body
PF: predicated region fallthrough
CT: control target
= control target key end

     0   :  { %vm19_vm0 = vcmask 254976   ;;  %v28_v3 = vlaneseq  ;;  %v215_v4 = vmov 0.0|0.0   ;;  %v216_v7 = vmov 0.0   ;;  %s276_s0 = inlined_call_operand.vmem [shape: f32[8,32], index: 0, kind: input, shape index: {}]   ;;  %s277_s1 = inlined_call_operand.vmem [shape: f32[32,16], index: 1, kind: input, shape index: {}]   ;;  %s278_s2 = inlined_call_operand.vmem [shape: f32[1,16], index: 2, kind: input, shape index: {}]   ;;  %s279_s3 = inlined_call_operand.hbm [shape: f32[2,16], index: 3, kind: output, shape index: {}]  }
   0x1   :  { %v60_v0 = vld [vmem:[%s277_s1] sm:$0xff]  ;;  %v61_v1 = vld [vmem:[%s277_s1 + $0x8] sm:$0xff]  ;;  %v62_v2 = vld [vmem:[%s277_s1 + $0x10] sm:$0xff]  ;;  %179 = vmatprep.subr.bf16.mxu0 %v215_v4  ;;  %20 = vst.msk [vmem:[#allocation2] sm:$0x3] %vm19_vm0, %v216_v7  ;;  %vm218_vm1 = vmmov 0  }
   0x2   :  { %v180_v5 = vpack.c.bf16 %v61_v1, %v60_v0  ;;  %v63_v6 = vld [vmem:[%s277_s1 + $0x18] sm:$0xff]  ;;  %v217_v8 = vmov 1983009808   ;;  %v29_v10 = vshrl.u32 %v28_v3, 7  ;;  %176 = vmatprep.mubr.msk.f32.mxu0 %vm218_vm1, %v216_v7 }
   0x3   :  { %v26_v9 = vunpack.c.l.s4 %v217_v8 }
   0x4   :  { %8 = vsyncpa [#allocation4], 0  ;;  %181 = vmatpush3.bf16.msra.mxu0 %v180_v5  ;;  %v183_v11 = vpack.c.bf16 %v63_v6, %v62_v2  ;;  %v21_v12 = vld [vmem:[%s276_s0] sm:$0xff]  ;;  %vm71_vm2 = vcmask 261120   ;;  %s219_s22 = smov [#allocation3]   ;;  %vm145_vm3 = vcmask 123904  }
   0x5   :  { %182 = vmatprep.subr.bf16.mxu0 %v215_v4  ;;  %v24_v13 = vcombine.high %v21_v12, %v21_v12  ;;  %v27_v14 = vunpack.c.0.s8 %v26_v9  ;;  %v161_v31 = vld [vmem:[%s278_s2] ss:$0 sm:$0xff]  ;;  %s153_s23 = sshll.u32 %s219_s22, 4  ;;  %s154_s23 = int_to_ptr.vmem [resolvable:$true] %s153_s23 }
   0x6   :  { %s191_s24 = scalar_lea.vmem %s154_s23, 32  ;;  %p196_p1 = scmp.lt.s32.totalorder %s154_s23, %s154_s23 }
   0x7   :  { %v30_v15 = vsub.s32 %v27_v14, %v29_v10  ;;  %p192_p0 = scmp.ne.s32.totalorder %s154_s23, %s191_s24  ;;  %p197_p2 = scmp.lt.s32.totalorder %s191_s24, %s191_s24 }
   0x8   :  { %184 = vmatpush3.bf16.msra.mxu0 %v183_v11  ;;  %v22_v26 = vld [vmem:[#allocation2] sm:$0x3] }
   0x9   :  { %v31_v16 = vrot.slane %v21_v12, %v30_v15  ;;  %v38_v17 = vrot.slane %v24_v13, %v30_v15  ;;  %p198_p3 = por %p197_p2, %p196_p1 }
   0xb   :  { %v39_v18 = vcombine.high %v31_v16, %v31_v16  ;;  %v40_v19 = vcombine.high %v38_v17, %v38_v17  ;;  %v46_v20 = vsel %vm19_vm0, %v31_v16, 0.0  ;;  %v49_v22 = vsel %vm19_vm0, %v38_v17, 0.0  ;;  %p199_p4 = pnand %p198_p3, %p192_p0 }
   0xd   :  { %v47_v21 = vsel %vm19_vm0, %v39_v18, 0.0  ;;  %v51_v24 = vsel %vm19_vm0, %v40_v19, 0.0 }
   0xe   :  { %v48_v23 = vadd.f32 %v47_v21, %v46_v20 }
  0x10   :  { %v50_v25 = vadd.f32 %v49_v22, %v48_v23 }
  0x12   :  { %v52_v27 = vadd.f32 %v51_v24, %v50_v25 }
  0x14   :  { %v53_v28 = vadd.f32 %v52_v27, %v22_v26 }
  0x16   :  { %54 = vst.msk [vmem:[#allocation2] sm:$0x3] %vm19_vm0, %v53_v28 }
  0x1d   :  { %v58_v29 = vld [vmem:[#allocation2] sm:$0x3] }
  0x1e   :  { %v59_v30 = vmul.f32 0.25, %v58_v29 }
  0x20   :  { %177 = vmatmul.mubr.msk.f32.vlgmr.msra.gmra.mrb[0].mxu0 %vm71_vm2, %v59_v30 }
  0xf3   :  { %v141_v32 = vpop.f32.mrb[0].mxu0 }
  0xf4   :  { %v142_v33 = vadd.f32 %v161_v31, %v141_v32  ;;  %v178_v34 = vpop.f32.mrb[1].mxu0 }
  0xf6   :  { %146 = vst.msk [vmem:[#allocation3] sm:$0x3] %vm145_vm3, %v142_v33 }
  0xf7   :  { %202 = shalt.err (!%p199_p4)
}
  0xf8   :  { %s203_s27 = scalar_lea.hbm %s279_s3, 32 }
  0xf9   :  { %p204_p5 = scmp.ne.s32.totalorder %s279_s3, %s203_s27  ;;  %p207_p6 = scmp.lt.u32.totalorder %s203_s27, %s279_s3 }
  0xfb   :  { %p209_p7 = pnand %p207_p6, %p204_p5 }
  0xfd   :  { %212 = shalt.err (!%p209_p7)
}
  0xfe   :  { %156 = dma.vmem_to_hbm [thread:$0]  %s154_s23, 32, %s279_s3, [#allocation4]  }
  0xff   :  { %213 = dma.done.wait [#allocation4], 32  }
 0x100   :  { %214 = vsyncadd [#allocation4], 4294967264 }
 0x101   :  { %160 = vsyncpa [#allocation4], 1 }

// kernel: vit_forward.4
= control target key start
LH: loop header
LB: loop body
LE: loop exit
PB: predicated region body
PF: predicated region fallthrough
CT: control target
= control target key end

     0   :  { %vm420_vm0 = vcmask 261120   ;;  %s964_s1 = inlined_call_operand.vmem [shape: f32[768,32], index: 1, kind: input, shape index: {}]   ;;  %s965_s0 = inlined_call_operand.vmem [shape: f32[8,768], index: 0, kind: input, shape index: {}]   ;;  %s966_s2 = inlined_call_operand.vmem [shape: f32[4,32], index: 2, kind: input, shape index: {}]   ;;  %s967_s3 = inlined_call_operand.vmem [shape: f32[8,32], index: 3, kind: output, shape index: {}]  }
   0x1   :  { %v36_v0 = vld [vmem:[%s964_s1 + $0x80] sm:$0xff]  ;;  %v37_v1 = vld [vmem:[%s964_s1 + $0x88] sm:$0xff]  ;;  %v38_v11 = vld [vmem:[%s964_s1 + $0x90] sm:$0xff] }
   0x2   :  { %v68_v2 = vld [vmem:[%s964_s1 + $0x180] sm:$0xff]  ;;  %v532_v3 = vpack.c.bf16 %v37_v1, %v36_v0  ;;  %v69_v4 = vld [vmem:[%s964_s1 + $0x188] sm:$0xff]  ;;  %v39_v13 = vld [vmem:[%s964_s1 + $0x98] sm:$0xff] }
   0x3   :  { %v20_v5 = vld [vmem:[%s964_s1] sm:$0xff]  ;;  %v21_v6 = vld [vmem:[%s964_s1 + $0x8] sm:$0xff]  ;;  %v564_v7 = vpack.c.bf16 %v69_v4, %v68_v2  ;;  %v70_v14 = vld [vmem:[%s964_s1 + $0x190] sm:$0xff]  ;;  %v536_v16 = vpack.c.bf16 %v39_v13, %v38_v11 }
   0x4   :  { %v534_v8 = vpack.c.bf16 %v21_v6, %v20_v5  ;;  %v52_v9 = vld [vmem:[%s964_s1 + $0x100] sm:$0xff]  ;;  %v53_v10 = vld [vmem:[%s964_s1 + $0x108] sm:$0xff]  ;;  %533 = vmatprep.subr.bf16.mxu0 %v532_v3  ;;  %v71_v15 = vld [vmem:[%s964_s1 + $0x198] sm:$0xff] }
   0x5   :  { %v566_v12 = vpack.c.bf16 %v53_v10, %v52_v9  ;;  %565 = vmatprep.subr.bf16.mxu1 %v564_v7  ;;  %v568_v17 = vpack.c.bf16 %v71_v15, %v70_v14  ;;  %v22_v18 = vld [vmem:[%s964_s1 + $0x10] sm:$0xff]  ;;  %v23_v19 = vld [vmem:[%s964_s1 + $0x18] sm:$0xff]  ;;  %v40_v23 = vld [vmem:[%s964_s1 + $0xa0] sm:$0xff] }
   0x6   :  { %535 = vmatpush3.bf16.msra.mxu0 %v534_v8  ;;  %v54_v20 = vld [vmem:[%s964_s1 + $0x110] sm:$0xff]  ;;  %v538_v21 = vpack.c.bf16 %v23_v19, %v22_v18  ;;  %v55_v22 = vld [vmem:[%s964_s1 + $0x118] sm:$0xff]  ;;  %v41_v24 = vld [vmem:[%s964_s1 + $0xa8] sm:$0xff] }
   0x7   :  { %567 = vmatpush3.bf16.msra.mxu1 %v566_v12  ;;  %537 = vmatprep.subr.bf16.mxu0 %v536_v16  ;;  %v570_v25 = vpack.c.bf16 %v55_v22, %v54_v20  ;;  %v540_v26 = vpack.c.bf16 %v41_v24, %v40_v23  ;;  %v72_v27 = vld [vmem:[%s964_s1 + $0x1a0] sm:$0xff]  ;;  %v73_v28 = vld [vmem:[%s964_s1 + $0x1a8] sm:$0xff]  ;;  %v42_v35 = vld [vmem:[%s964_s1 + $0xb0] sm:$0xff] }
   0x8   :  { %569 = vmatprep.subr.bf16.mxu1 %v568_v17  ;;  %v24_v29 = vld [vmem:[%s964_s1 + $0x20] sm:$0xff]  ;;  %v572_v30 = vpack.c.bf16 %v73_v28, %v72_v27  ;;  %v25_v31 = vld [vmem:[%s964_s1 + $0x28] sm:$0xff]  ;;  %v43_v36 = vld [vmem:[%s964_s1 + $0xb8] sm:$0xff] }
   0x9   :  { %v56_v32 = vld [vmem:[%s964_s1 + $0x120] sm:$0xff]  ;;  %v57_v33 = vld [vmem:[%s964_s1 + $0x128] sm:$0xff]  ;;  %v542_v34 = vpack.c.bf16 %v25_v31, %v24_v29  ;;  %v74_v37 = vld [vmem:[%s964_s1 + $0x1b0] sm:$0xff]  ;;  %v544_v39 = vpack.c.bf16 %v43_v36, %v42_v35 }
   0xa   :  { %539 = vmatpush3.bf16.msra.mxu0 %v538_v21  ;;  %v574_v38 = vpack.c.bf16 %v57_v33, %v56_v32  ;;  %v75_v40 = vld [vmem:[%s964_s1 + $0x1b8] sm:$0xff]  ;;  %v26_v41 = vld [vmem:[%s964_s1 + $0x30] sm:$0xff]  ;;  %v44_v46 = vld [vmem:[%s964_s1 + $0xc0] sm:$0xff] }
   0xb   :  { %571 = vmatpush3.bf16.msra.mxu1 %v570_v25  ;;  %541 = vmatprep.subr.bf16.mxu0 %v540_v26  ;;  %v27_v42 = vld [vmem:[%s964_s1 + $0x38] sm:$0xff]  ;;  %v576_v43 = vpack.c.bf16 %v75_v40, %v74_v37  ;;  %v58_v44 = vld [vmem:[%s964_s1 + $0x130] sm:$0xff]  ;;  %v45_v47 = vld [vmem:[%s964_s1 + $0xc8] sm:$0xff] }
   0xc   :  { %573 = vmatprep.subr.bf16.mxu1 %v572_v30  ;;  %v59_v45 = vld [vmem:[%s964_s1 + $0x138] sm:$0xff]  ;;  %v76_v48 = vld [vmem:[%s964_s1 + $0x1c0] sm:$0xff]  ;;  %v77_v49 = vld [vmem:[%s964_s1 + $0x1c8] sm:$0xff]  ;;  %v546_v50 = vpack.c.bf16 %v27_v42, %v26_v41  ;;  %v548_v52 = vpack.c.bf16 %v45_v47, %v44_v46 }
   0xd   :  { %v578_v51 = vpack.c.bf16 %v59_v45, %v58_v44  ;;  %v28_v53 = vld [vmem:[%s964_s1 + $0x40] sm:$0xff]  ;;  %v29_v54 = vld [vmem:[%s964_s1 + $0x48] sm:$0xff]  ;;  %v580_v56 = vpack.c.bf16 %v77_v49, %v76_v48  ;;  %v46_v58 = vld [vmem:[%s964_s1 + $0xd0] sm:$0xff] }
   0xe   :  { %543 = vmatpush3.bf16.msra.mxu0 %v542_v34  ;;  %v60_v55 = vld [vmem:[%s964_s1 + $0x140] sm:$0xff]  ;;  %v61_v57 = vld [vmem:[%s964_s1 + $0x148] sm:$0xff]  ;;  %v47_v59 = vld [vmem:[%s964_s1 + $0xd8] sm:$0xff]  ;;  %v550_v62 = vpack.c.bf16 %v29_v54, %v28_v53 }
   0xf   :  { %575 = vmatpush3.bf16.msra.mxu1 %v574_v38  ;;  %545 = vmatprep.subr.bf16.mxu0 %v544_v39  ;;  %v78_v60 = vld [vmem:[%s964_s1 + $0x1d0] sm:$0xff]  ;;  %v79_v61 = vld [vmem:[%s964_s1 + $0x1d8] sm:$0xff]  ;;  %v582_v63 = vpack.c.bf16 %v61_v57, %v60_v55  ;;  %v552_v0 = vpack.c.bf16 %v47_v59, %v46_v58  ;;  %v48_v6 = vld [vmem:[%s964_s1 + $0xe0] sm:$0xff] }
  0x10   :  { %577 = vmatprep.subr.bf16.mxu1 %v576_v43  ;;  %v30_v1 = vld [vmem:[%s964_s1 + $0x50] sm:$0xff]  ;;  %v31_v2 = vld [vmem:[%s964_s1 + $0x58] sm:$0xff]  ;;  %v584_v4 = vpack.c.bf16 %v79_v61, %v78_v60  ;;  %v49_v7 = vld [vmem:[%s964_s1 + $0xe8] sm:$0xff] }
  0x11   :  { %v62_v3 = vld [vmem:[%s964_s1 + $0x150] sm:$0xff]  ;;  %v63_v5 = vld [vmem:[%s964_s1 + $0x158] sm:$0xff]  ;;  %v80_v8 = vld [vmem:[%s964_s1 + $0x1e0] sm:$0xff]  ;;  %v554_v10 = vpack.c.bf16 %v31_v2, %v30_v1  ;;  %v556_v14 = vpack.c.bf16 %v49_v7, %v48_v6 }
  0x12   :  { %547 = vmatpush3.bf16.msra.mxu0 %v546_v50  ;;  %v81_v9 = vld [vmem:[%s964_s1 + $0x1e8] sm:$0xff]  ;;  %v32_v11 = vld [vmem:[%s964_s1 + $0x60] sm:$0xff]  ;;  %v586_v13 = vpack.c.bf16 %v63_v5, %v62_v3  ;;  %v17_v17 = vld [vmem:[%s965_s0 + $0x18] sm:$0xff] }
  0x13   :  { %579 = vmatpush3.bf16.msra.mxu1 %v578_v51  ;;  %549 = vmatprep.subr.bf16.mxu0 %v548_v52  ;;  %v33_v12 = vld [vmem:[%s964_s1 + $0x68] sm:$0xff]  ;;  %v64_v15 = vld [vmem:[%s964_s1 + $0x160] sm:$0xff]  ;;  %v588_v18 = vpack.c.bf16 %v81_v9, %v80_v8  ;;  %v50_v20 = vld [vmem:[%s964_s1 + $0xf0] sm:$0xff] }
  0x14   :  { %581 = vmatprep.subr.bf16.mxu1 %v580_v56  ;;  %v15_v16 = vld [vmem:[%s965_s0 + $0x8] sm:$0xff]  ;;  %v51_v21 = vld [vmem:[%s964_s1 + $0xf8] sm:$0xff]  ;;  %v82_v22 = vld [vmem:[%s964_s1 + $0x1f0] sm:$0xff]  ;;  %250 = vmatprep.mubr.f32.mxu1 %v17_v17  ;;  %v558_v24 = vpack.c.bf16 %v33_v12, %v32_v11 }
  0x15   :  { %v65_v19 = vld [vmem:[%s964_s1 + $0x168] sm:$0xff]  ;;  %180 = vmatprep.mubr.f32.mxu0 %v15_v16  ;;  %v83_v23 = vld [vmem:[%s964_s1 + $0x1f8] sm:$0xff]  ;;  %v560_v26 = vpack.c.bf16 %v51_v21, %v50_v20  ;;  %v34_v27 = vld [vmem:[%s964_s1 + $0x70] sm:$0xff] }
  0x16   :  { %551 = vmatpush3.bf16.msra.mxu0 %v550_v62  ;;  %v590_v25 = vpack.c.bf16 %v65_v19, %v64_v15  ;;  %v35_v28 = vld [vmem:[%s964_s1 + $0x78] sm:$0xff]  ;;  %v66_v29 = vld [vmem:[%s964_s1 + $0x170] sm:$0xff]  ;;  %v592_v30 = vpack.c.bf16 %v83_v23, %v82_v22  ;;  %v100_v32 = vld [vmem:[%s964_s1 + $0x280] sm:$0xff] }
  0x17   :  { %583 = vmatpush3.bf16.msra.mxu1 %v582_v63  ;;  %553 = vmatprep.subr.bf16.mxu0 %v552_v0  ;;  %v67_v31 = vld [vmem:[%s964_s1 + $0x178] sm:$0xff]  ;;  %v101_v33 = vld [vmem:[%s964_s1 + $0x288] sm:$0xff]  ;;  %v562_v34 = vpack.c.bf16 %v35_v28, %v34_v27  ;;  %v84_v37 = vld [vmem:[%s964_s1 + $0x200] sm:$0xff] }
  0x18   :  { %585 = vmatprep.subr.bf16.mxu1 %v584_v4  ;;  %v594_v35 = vpack.c.bf16 %v67_v31, %v66_v29  ;;  %v596_v36 = vpack.c.bf16 %v101_v33, %v100_v32  ;;  %v85_v38 = vld [vmem:[%s964_s1 + $0x208] sm:$0xff]  ;;  %v102_v39 = vld [vmem:[%s964_s1 + $0x290] sm:$0xff]  ;;  %v103_v40 = vld [vmem:[%s964_s1 + $0x298] sm:$0xff]  ;;  %v331_v29 = vlaneseq }
  0x19   :  { %v14_v41 = vld [vmem:[%s965_s0] sm:$0xff]  ;;  %v598_v42 = vpack.c.bf16 %v85_v38, %v84_v37  ;;  %v16_v43 = vld [vmem:[%s965_s0 + $0x10] sm:$0xff]  ;;  %v600_v44 = vpack.c.bf16 %v103_v40, %v102_v39  ;;  %v87_v46 = vld [vmem:[%s964_s1 + $0x218] sm:$0xff] }
  0x1a   :  { %555 = vmatpush3.bf16.msra.mxu0 %v554_v10  ;;  %v86_v45 = vld [vmem:[%s964_s1 + $0x210] sm:$0xff]  ;;  %v104_v47 = vld [vmem:[%s964_s1 + $0x2a0] sm:$0xff]  ;;  %v105_v48 = vld [vmem:[%s964_s1 + $0x2a8] sm:$0xff]  ;;  %v332_v32 = vshrl.u32 %v331_v29, 7 }
  0x1b   :  { %587 = vmatpush3.bf16.msra.mxu1 %v586_v13  ;;  %557 = vmatprep.subr.bf16.mxu0 %v556_v14  ;;  %v19_v49 = vld [vmem:[%s965_s0 + $0x28] sm:$0xff]  ;;  %v602_v50 = vpack.c.bf16 %v87_v46, %v86_v45  ;;  %v604_v51 = vpack.c.bf16 %v105_v48, %v104_v47  ;;  %v88_v52 = vld [vmem:[%s964_s1 + $0x220] sm:$0xff]  ;;  %v106_v54 = vld [vmem:[%s964_s1 + $0x2b0] sm:$0xff] }
  0x1c   :  { %589 = vmatprep.subr.bf16.mxu1 %v588_v18  ;;  %v89_v53 = vld [vmem:[%s964_s1 + $0x228] sm:$0xff]  ;;  %v107_v55 = vld [vmem:[%s964_s1 + $0x2b8] sm:$0xff]  ;;  %v90_v58 = vld [vmem:[%s964_s1 + $0x230] sm:$0xff]  ;;  %v376_v46 = vsub.s32 0, %v332_v32 }
  0x1d   :  { %v606_v56 = vpack.c.bf16 %v89_v53, %v88_v52  ;;  %v608_v57 = vpack.c.bf16 %v107_v55, %v106_v54  ;;  %v91_v59 = vld [vmem:[%s964_s1 + $0x238] sm:$0xff]  ;;  %v108_v60 = vld [vmem:[%s964_s1 + $0x2c0] sm:$0xff]  ;;  %v109_v61 = vld [vmem:[%s964_s1 + $0x2c8] sm:$0xff] }
  0x1e   :  { %559 = vmatpush3.bf16.msra.mxu0 %v558_v24  ;;  %v610_v62 = vpack.c.bf16 %v91_v59, %v90_v58  ;;  %v612_v63 = vpack.c.bf16 %v109_v61, %v108_v60  ;;  %v92_v0 = vld [vmem:[%s964_s1 + $0x240] sm:$0xff]  ;;  %v93_v1 = vld [vmem:[%s964_s1 + $0x248] sm:$0xff]  ;;  %v110_v2 = vld [vmem:[%s964_s1 + $0x2d0] sm:$0xff] }
  0x1f   :  { %591 = vmatpush3.bf16.msra.mxu1 %v590_v25  ;;  %561 = vmatprep.subr.bf16.mxu0 %v560_v26  ;;  %v111_v3 = vld [vmem:[%s964_s1 + $0x2d8] sm:$0xff]  ;;  %v614_v4 = vpack.c.bf16 %v93_v1, %v92_v0  ;;  %v94_v6 = vld [vmem:[%s964_s1 + $0x250] sm:$0xff]  ;;  %v112_v8 = vld [vmem:[%s964_s1 + $0x2e0] sm:$0xff] }
  0x20   :  { %593 = vmatprep.subr.bf16.mxu1 %v592_v30  ;;  %v616_v5 = vpack.c.bf16 %v111_v3, %v110_v2  ;;  %v95_v7 = vld [vmem:[%s964_s1 + $0x258] sm:$0xff]  ;;  %v113_v9 = vld [vmem:[%s964_s1 + $0x2e8] sm:$0xff]  ;;  %v96_v12 = vld [vmem:[%s964_s1 + $0x260] sm:$0xff]  ;;  %v630_v30 = vmov 1966171168  }
  0x21   :  { %v618_v10 = vpack.c.bf16 %v95_v7, %v94_v6  ;;  %v620_v11 = vpack.c.bf16 %v113_v9, %v112_v8  ;;  %v97_v13 = vld [vmem:[%s964_s1 + $0x268] sm:$0xff]  ;;  %v114_v14 = vld [vmem:[%s964_s1 + $0x2f0] sm:$0xff]  ;;  %v115_v15 = vld [vmem:[%s964_s1 + $0x2f8] sm:$0xff]  ;;  %v359_v31 = vunpack.c.l.s4 %v630_v30 }
  0x22   :  { %563 = vmatpush3.bf16.msra.mxu0 %v562_v34  ;;  %v622_v16 = vpack.c.bf16 %v97_v13, %v96_v12  ;;  %v624_v17 = vpack.c.bf16 %v115_v15, %v114_v14  ;;  %v98_v18 = vld [vmem:[%s964_s1 + $0x270] sm:$0xff]  ;;  %v99_v19 = vld [vmem:[%s964_s1 + $0x278] sm:$0xff]  ;;  %v18_v21 = vld [vmem:[%s965_s0 + $0x20] sm:$0xff] }
  0x23   :  { %595 = vmatpush3.bf16.msra.mxu1 %v594_v35  ;;  %597 = vmatprep.subr.bf16.mxu0 %v596_v36  ;;  %v626_v20 = vpack.c.bf16 %v99_v19, %v98_v18  ;;  %v360_v33 = vunpack.c.0.s8 %v359_v31  ;;  %v426_v34 = vld.sshfl [vmem:[%s966_s2] sm:$0x33 pattern:$0x75316420]  ;;  %v631_v35 = vmov 1983009808  }
  0x24   :  { %v329_v36 = vunpack.c.l.s4 %v631_v35  ;;  %v357_v37 = vcombine.high %v426_v34, %v426_v34 }
  0x25   :  { %181 = vmatmul.mubr.f32.vlgmr.msra.gmra.mrb[0].mxu0 %v14_v41  ;;  %v363_v38 = vsub.s32 %v360_v33, %v332_v32 }
  0x26   :  { %251 = vmatmul.mubr.f32.vlgmr.msra.gmra.mrb[0].mxu1 %v16_v43  ;;  %599 = vmatpush3.bf16.msra.mxu0 %v598_v42  ;;  %v330_v39 = vunpack.c.0.s8 %v329_v36 }
  0x27   :  { %601 = vmatprep.subr.bf16.mxu0 %v600_v44  ;;  %320 = vmatprep.mubr.f32.mxu0 %v19_v49  ;;  %v364_v41 = vrot.slane %v426_v34, %v363_v38  ;;  %v371_v42 = vrot.slane %v357_v37, %v363_v38 }
  0x28   :  { %v333_v45 = vsub.s32 %v330_v39, %v332_v32 }
  0x29   :  { %v372_v48 = vcombine.high %v364_v41, %v364_v41  ;;  %v373_v49 = vcombine.high %v371_v42, %v371_v42  ;;  %v377_v52 = vrot.slane %v364_v41, %v376_v46  ;;  %v381_v53 = vrot.slane %v371_v42, %v376_v46 }
  0x2a   :  { %603 = vmatpush3.bf16.msra.mxu0 %v602_v50 }
  0x2b   :  { %605 = vmatprep.subr.bf16.mxu0 %v604_v51 }
  0x2e   :  { %607 = vmatpush3.bf16.msra.mxu0 %v606_v56  ;;  %v385_v56 = vrot.slane %v372_v48, %v376_v46 }
  0x2f   :  { %609 = vmatprep.subr.bf16.mxu0 %v608_v57  ;;  %v389_v57 = vrot.slane %v373_v49, %v376_v46 }
  0x32   :  { %611 = vmatpush3.bf16.msra.mxu0 %v610_v62 }
  0x33   :  { %613 = vmatprep.subr.bf16.mxu0 %v612_v63 }
  0x36   :  { %615 = vmatpush3.bf16.msra.mxu0 %v614_v4 }
  0x37   :  { %617 = vmatprep.subr.bf16.mxu0 %v616_v5 }
  0x3a   :  { %619 = vmatpush3.bf16.msra.mxu0 %v618_v10 }
  0x3b   :  { %621 = vmatprep.subr.bf16.mxu0 %v620_v11 }
  0x3e   :  { %623 = vmatpush3.bf16.msra.mxu0 %v622_v16 }
  0x3f   :  { %625 = vmatprep.subr.bf16.mxu0 %v624_v17 }
  0x42   :  { %627 = vmatpush3.bf16.msra.mxu0 %v626_v20 }
  0x45   :  { %321 = vmatmul.mubr.f32.vlgmr.msra.gmra.mrb[2].mxu0 %v18_v21 }
  0xf8   :  { %v459_v22 = vpop.f32.mrb[0].mxu0 }
  0xf9   :  { %v494_v23 = vpop.f32.mrb[0].mxu1  ;;  %v460_v24 = vpop.f32.mrb[1].mxu0 }
  0xfa   :  { %v461_v25 = vadd.f32 %v460_v24, %v459_v22  ;;  %v495_v26 = vpop.f32.mrb[1].mxu1 }
  0xfb   :  { %v496_v27 = vadd.f32 %v495_v26, %v494_v23 }
  0xfd   :  { %v253_v28 = vadd.f32 %v496_v27, %v461_v25 }
 0x118   :  { %v529_v40 = vpop.f32.mrb[2].mxu0 }
 0x119   :  { %v530_v43 = vpop.f32.mrb[3].mxu0 }
 0x11a   :  { %v531_v44 = vadd.f32 %v530_v43, %v529_v40 }
 0x11c   :  { %v323_v47 = vadd.f32 %v531_v44, %v253_v28 }
 0x11e   :  { %v327_v50 = vcombine.high %v323_v47, %v323_v47  ;;  %v334_v51 = vrot.slane %v323_v47, %v333_v45 }
 0x120   :  { %v341_v54 = vrot.slane %v327_v50, %v333_v45  ;;  %v342_v55 = vcombine.high %v334_v51, %v334_v51  ;;  %v394_v59 = vadd.f32 %v377_v52, %v334_v51 }
 0x122   :  { %v343_v58 = vcombine.high %v341_v54, %v341_v54  ;;  %v395_v60 = vadd.f32 %v381_v53, %v342_v55  ;;  %v396_v61 = vadd.f32 %v385_v56, %v341_v54 }
 0x124   :  { %v397_v62 = vadd.f32 %v389_v57, %v343_v58  ;;  %v402_v63 = vcombine.low %v394_v59, %v395_v60 }
 0x126   :  { %v403_v0 = vcombine.low %v396_v61, %v397_v62  ;;  %v410_v1 = vrot.slane %v402_v63, %v333_v45 }
 0x128   :  { %v417_v2 = vrot.slane %v403_v0, %v333_v45 }
 0x12a   :  { %v418_v3 = vcombine.low %v410_v1, %v417_v2 }
 0x12c   :  { %421 = vst.msk [vmem:[%s967_s3] sm:$0xff] %vm420_vm0, %v418_v3 }

// kernel: vit_forward.5
= control target key start
LH: loop header
LB: loop body
LE: loop exit
PB: predicated region body
PF: predicated region fallthrough
CT: control target
= control target key end

     0   :  { %v3830_v0 = vmov 0.0|0.0   ;;  %vm3831_vm0 = vmmov 0   ;;  %v3832_v4 = vmov 0.0   ;;  %vm56_vm1 = vcmask 261120   ;;  %s3834_s19 = smov 96   ;;  %s3836_s20 = smov 88   ;;  %s4394_s1 = inlined_call_operand.vmem [shape: f32[32,96], index: 1, kind: input, shape index: {}]   ;;  %s4395_s0 = inlined_call_operand.vmem [shape: f32[8,32], index: 0, kind: input, shape index: {}]   ;;  %s4396_s2 = inlined_call_operand.vmem [shape: f32[1,96], index: 2, kind: input, shape index: {}]   ;;  %s4397_s3 = inlined_call_operand.vmem [shape: f32[32,32], index: 3, kind: input, shape index: {}]   ;;  %s4398_s4 = inlined_call_operand.vmem [shape: f32[1,32], index: 4, kind: input, shape index: {}]   ;;  %s4399_s7 = inlined_call_operand.vmem [shape: f32[32,128], index: 7, kind: input, shape index: {}]   ;;  %s4400_s9 = inlined_call_operand.vmem [shape: f32[128,32], index: 9, kind: input, shape index: {}]   ;;  %s4401_s5 = inlined_call_operand.vmem [shape: f32[1,32], index: 5, kind: input, shape index: {}]   ;;  %s4402_s6 = inlined_call_operand.vmem [shape: f32[1,32], index: 6, kind: input, shape index: {}]   ;;  %s4403_s8 = inlined_call_operand.vmem [shape: f32[1,128], index: 8, kind: input, shape index: {}]   ;;  %s4404_s10 = inlined_call_operand.vmem [shape: f32[1,32], index: 10, kind: input, shape index: {}]   ;;  %s4405_s11 = inlined_call_operand.vmem [shape: f32[1,32], index: 11, kind: input, shape index: {}]   ;;  %s4406_s12 = inlined_call_operand.vmem [shape: f32[1,32], index: 12, kind: input, shape index: {}]   ;;  %s4407_s13 = inlined_call_operand.vmem [shape: f32[8,32], index: 13, kind: output, shape index: {}]  }
   0x1   :  { %3701 = vmatprep.subr.bf16.mxu1 %v3830_v0  ;;  %v45_v1 = vld [vmem:[%s4394_s1] sm:$0xff]  ;;  %v46_v2 = vld [vmem:[%s4394_s1 + $0x8] sm:$0xff]  ;;  %v47_v3 = vld [vmem:[%s4394_s1 + $0x10] sm:$0xff]  ;;  %3481 = vmatprep.mubr.msk.f32.mxu1 %vm3831_vm0, %v3832_v4  ;;  %v3833_v9 = vmov 1983009808   ;;  %v136_v11 = vlaneseq  ;;  %vm176_vm2 = vcmask 64512  }
   0x2   :  { %v3702_v5 = vpack.c.bf16 %v46_v2, %v45_v1  ;;  %v48_v6 = vld [vmem:[%s4394_s1 + $0x18] sm:$0xff]  ;;  %3494 = vmatprep.subr.mxu0 %v3832_v4  ;;  %3496 = vmatprep.mubr.msk.f32.mxu0 %vm3831_vm0, %v3832_v4  ;;  %v44_v8 = vld [vmem:[%s4395_s0] sm:$0xff]  ;;  %v134_v10 = vunpack.c.l.s4 %v3833_v9  ;;  %vm500_vm3 = vcmask 9216   ;;  %vm551_vm4 = vcmask 1041408   ;;  %s3837_s21 = smov 120   ;;  %s3838_s22 = smov 56  }
   0x3   :  { %v3705_v7 = vpack.c.bf16 %v48_v6, %v47_v3  ;;  %v137_v13 = vshrl.u32 %v136_v11, 7  ;;  %v3302_v14 = vld [vmem:[%s4396_s2] ss:$0 sm:$0xff]  ;;  %s3835_s2 = smov 64   ;;  %vm547_vm5 = vcmask 15360   ;;  %s3839_s23 = smov 80  }
   0x4   :  { %3703 = vmatpush3.bf16.msra.mxu1 %v3702_v5  ;;  %v135_v12 = vunpack.c.0.s8 %v134_v10  ;;  %s3840_s24 = smov 112   ;;  %s3841_s25 = smov 48   ;;  %vm2970_vm6 = vcmask 130048   ;;  %vm2972_vm7 = vcmask 195584  }
   0x5   :  { %3704 = vmatprep.subr.bf16.mxu1 %v3830_v0  ;;  %s3842_s26 = smov 72   ;;  %s3843_s27 = smov 104  }
   0x6   :  { %v3947_v15 = vsub.s32 %v135_v12, %v137_v13  ;;  %s3844_s28 = smov 40   ;;  %s3845_s29 = smov 16  }
   0x7   :  { %s3846_s30 = smov 8  }
   0x8   :  { %3706 = vmatpush3.bf16.msra.mxu1 %v3705_v7 }
   0x9   :  { %3484 = vmatprep.subr.mxu1 %v3832_v4 }
   0xb   :  { %3482 = vmatmul.mubr.msk.f32.vlgmr.msra.gmra.mrb[0].mxu1 %vm56_vm1, %v44_v8 }
   0xc   :  { %3486 = vmatprep.mubr.msk.f32.mxu1 %vm3831_vm0, %v3832_v4 }
  0xde   :  { %v126_v16 = vpop.f32.mrb[0].mxu1 }
  0xdf   :  { %v127_v17 = vadd.f32 %v3302_v14, %v126_v16  ;;  %v3483_v18 = vpop.f32.mrb[1].mxu1 }
  0xe1   :  { %v150_v19 = vcombine.high %v127_v17, %v127_v17  ;;  %v157_v20 = vrot.slane %v127_v17, %v3947_v15  ;;  %v130_v28 = vmul.f32 0.35355338, %v127_v17 }
  0xe3   :  { %v164_v21 = vrot.slane %v150_v19, %v3947_v15  ;;  %v165_v22 = vcombine.high %v157_v20, %v157_v20  ;;  %v3952_v23 = vrot.slane %v157_v20, %v3947_v15  ;;  %v132_v29 = vcombine.high %v130_v28, %v130_v28 }
  0xe4   :  { %v3969_v32 = vrot.slane %v130_v28, %v3947_v15 }
  0xe5   :  { %v166_v24 = vcombine.high %v164_v21, %v164_v21  ;;  %v3955_v25 = vrot.slane %v164_v21, %v3947_v15  ;;  %174 = vrot.lane.b32.xlu0 %v3952_v23, %s3834_s19  ;;  %v3960_v26 = vrot.slane %v165_v22, %v3947_v15  ;;  %v3974_v33 = vrot.slane %v132_v29, %v3947_v15 }
  0xe6   :  { %v3984_v35 = vcombine.high %v3969_v32, %v3969_v32  ;;  %v4039_v12 = vrot.slane %v3969_v32, %v3947_v15 }
  0xe7   :  { %341 = vrot.lane.b32.xlu1 %v3955_v25, %s3834_s19  ;;  %v3963_v27 = vrot.slane %v166_v24, %v3947_v15  ;;  %v3998_v37 = vcombine.high %v3974_v33, %v3974_v33  ;;  %v4046_v13 = vrot.slane %v3974_v33, %v3947_v15 }
  0xe8   :  { %v4027_v10 = vrot.slane %v3984_v35, %v3947_v15 }
  0xe9   :  { %258 = vrot.lane.b32.xlu0 %v3960_v26, %s3834_s19  ;;  %v4034_v11 = vrot.slane %v3998_v37, %v3947_v15 }
  0xeb   :  { %424 = vrot.lane.b32.xlu1 %v3963_v27, %s3834_s19 }
 0x157   :  { %v175_v30 = vpop.permute.xlu0 %174 }
 0x158   :  { %3485 = vmatpush3.xpose.msk.msra.mxu1 %vm176_vm2, %v175_v30 }
 0x159   :  { %v342_v31 = vpop.permute.xlu1 %341  ;;  %3489 = vmatprep.subr.mxu1 %v3832_v4 }
 0x15a   :  { %3495 = vmatpush3.xpose.msk.msra.mxu0 %vm176_vm2, %v342_v31 }
 0x15b   :  { %3504 = vmatprep.subr.mxu0 %v3832_v4  ;;  %v259_v34 = vpop.permute.xlu0 %258  ;;  %3487 = vmatmul.mubr.msk.f32.vlgmr.msra.gmra.mrb[2].mxu1 %vm176_vm2, %v3969_v32 }
 0x15c   :  { %3490 = vmatpush3.xpose.msk.msra.mxu1 %vm176_vm2, %v259_v34  ;;  %3491 = vmatprep.mubr.msk.f32.mxu1 %vm3831_vm0, %v3832_v4 }
 0x15d   :  { %3497 = vmatmul.mubr.msk.f32.vlgmr.msra.gmra.mrb[0].mxu0 %vm176_vm2, %v3974_v33  ;;  %3499 = vmatprep.subr.mxu1 %v3832_v4  ;;  %v425_v36 = vpop.permute.xlu1 %424 }
 0x15e   :  { %3506 = vmatprep.mubr.msk.f32.mxu0 %vm3831_vm0, %v3832_v4 }
 0x15f   :  { %3492 = vmatmul.mubr.msk.f32.vlgmr.msra.gmra.mrb[4].mxu1 %vm176_vm2, %v3984_v35 }
 0x160   :  { %3500 = vmatpush3.xpose.msk.msra.mxu1 %vm176_vm2, %v425_v36  ;;  %3501 = vmatprep.mubr.msk.f32.mxu1 %vm3831_vm0, %v3832_v4 }
 0x161   :  { %3509 = vmatprep.subr.mxu1 %v3832_v4 }
 0x163   :  { %3502 = vmatmul.mubr.msk.f32.vlgmr.msra.gmra.mrb[6].mxu1 %vm176_vm2, %v3998_v37 }
 0x164   :  { %3511 = vmatprep.mubr.msk.f32.mxu1 %vm3831_vm0, %v3832_v4 }
 0x22e   :  { %v247_v38 = vpop.f32.mrb[2].mxu1 }
 0x22f   :  { %v3488_v39 = vpop.f32.mrb[3].mxu1  ;;  %v501_v41 = vsel %vm500_vm3, %v247_v38, -inf }
 0x230   :  { %v413_v40 = vpop.f32.mrb[0].mxu0  ;;  %502 = vmax.xlane.f32.xlu0 %v501_v41 }
 0x231   :  { %v3498_v42 = vpop.f32.mrb[1].mxu0  ;;  %v507_v45 = vsel %vm500_vm3, %v413_v40, -inf }
 0x232   :  { %v330_v43 = vpop.f32.mrb[4].mxu1 }
 0x233   :  { %v3493_v44 = vpop.f32.mrb[5].mxu1  ;;  %v504_v46 = vsel %vm500_vm3, %v330_v43, -inf }
 0x234   :  { %508 = vmax.xlane.f32.xlu0 %v507_v45  ;;  %505 = vmax.xlane.f32.xlu1 %v504_v46 }
 0x236   :  { %v496_v47 = vpop.f32.mrb[6].mxu1 }
 0x237   :  { %v3503_v48 = vpop.f32.mrb[7].mxu1  ;;  %v510_v49 = vsel %vm500_vm3, %v496_v47, -inf }
 0x238   :  { %511 = vmax.xlane.f32.xlu0 %v510_v49 }
 0x245   :  { %545 = vrot.lane.b32.xlu1 %v3952_v23, %s3835_s2 }
 0x249   :  { %701 = vrot.lane.b32.xlu1 %v3955_v25, %s3835_s2 }
 0x24d   :  { %778 = vrot.lane.b32.xlu1 %v3963_v27, %s3835_s2 }
 0x24e   :  { %624 = vrot.lane.b32.xlu0 %v3960_v26, %s3835_s2 }
 0x251   :  { %949 = vrot.lane.b32.xlu1 %v3960_v26, %s3836_s20 }
 0x252   :  { %864 = vrot.lane.b32.xlu0 %v3952_v23, %s3836_s20 }
 0x2bd   :  { %v503_v50 = vpop.xlane.xlu0 %502 }
 0x2be   :  { %v513_v51 = vsub.f32 %v247_v38, %v503_v50 }
 0x2c0   :  { %v517_v52 = vmul.f32 1.442695, %v513_v51 }
 0x2c1   :  { %v509_v53 = vpop.xlane.xlu0 %508  ;;  %v506_v54 = vpop.xlane.xlu1 %505 }
 0x2c2   :  { %3761 = vpow2.f32 %v517_v52  ;;  %v515_v55 = vsub.f32 %v413_v40, %v509_v53  ;;  %v514_v56 = vsub.f32 %v330_v43, %v506_v54 }
 0x2c4   :  { %v521_v57 = vmul.f32 1.442695, %v515_v55  ;;  %v519_v58 = vmul.f32 1.442695, %v514_v56 }
 0x2c5   :  { %v546_v59 = vpop.permute.xlu1 %545  ;;  %v512_v60 = vpop.xlane.xlu0 %511 }
 0x2c6   :  { %3763 = vpow2.f32 %v521_v57  ;;  %v516_v61 = vsub.f32 %v496_v47, %v512_v60  ;;  %3505 = vmatpush3.msk.msra.mxu0 %vm551_vm4, %v546_v59 }
 0x2c7   :  { %3765 = vpow2.f32 %v519_v58  ;;  %3514 = vmatprep.subr.mxu0 %v3832_v4 }
 0x2c8   :  { %v523_v62 = vmul.f32 1.442695, %v516_v61 }
 0x2c9   :  { %v625_v63 = vpop.permute.xlu0 %624  ;;  %v702_v14 = vpop.permute.xlu1 %701 }
 0x2ca   :  { %3767 = vpow2.f32 %v523_v62  ;;  %3510 = vmatpush3.msk.msra.mxu1 %vm551_vm4, %v625_v63 }
 0x2cb   :  { %3519 = vmatprep.subr.mxu1 %v3832_v4 }
 0x2cc   :  { %v3762_v1 = vpop.eup %3761 }
 0x2cd   :  { %v525_v2 = vsel %vm500_vm3, %v3762_v1, 0.0  ;;  %v779_v16 = vpop.permute.xlu1 %778  ;;  %v865_v19 = vpop.permute.xlu0 %864 }
 0x2ce   :  { %526 = vadd.xlane.f32.xlu1 %v525_v2 }
 0x2d0   :  { %v3764_v3 = vpop.eup %3763 }
 0x2d1   :  { %v3766_v5 = vpop.eup %3765  ;;  %v531_v6 = vsel %vm500_vm3, %v3764_v3, 0.0  ;;  %v950_v17 = vpop.permute.xlu1 %949 }
 0x2d2   :  { %532 = vadd.xlane.f32.xlu1 %v531_v6  ;;  %v528_v7 = vsel %vm500_vm3, %v3766_v5, 0.0 }
 0x2d3   :  { %529 = vadd.xlane.f32.xlu0 %v528_v7 }
 0x2d4   :  { %v3768_v8 = vpop.eup %3767 }
 0x2d5   :  { %v534_v9 = vsel %vm500_vm3, %v3768_v8, 0.0 }
 0x2d7   :  { %535 = vadd.xlane.f32.xlu0 %v534_v9 }
 0x2e3   :  { %947 = vrot.lane.b32.xlu1 %v4027_v10, %s3837_s21 }
 0x2e7   :  { %1119 = vrot.lane.b32.xlu1 %v3963_v27, %s3836_s20 }
 0x2eb   :  { %1117 = vrot.lane.b32.xlu1 %v4034_v11, %s3837_s21 }
 0x2ed   :  { %862 = vrot.lane.b32.xlu0 %v4039_v12, %s3837_s21 }
 0x2f1   :  { %1034 = vrot.lane.b32.xlu0 %v3955_v25, %s3836_s20 }
 0x2f5   :  { %1032 = vrot.lane.b32.xlu0 %v4046_v13, %s3837_s21 }
 0x35b   :  { %v527_v18 = vpop.xlane.xlu1 %526 }
 0x35c   :  { %3769 = vrcp.f32 %v527_v18 }
 0x35f   :  { %v533_v20 = vpop.xlane.xlu1 %532 }
 0x360   :  { %3771 = vrcp.f32 %v533_v20  ;;  %v530_v21 = vpop.xlane.xlu0 %529 }
 0x361   :  { %3773 = vrcp.f32 %v530_v21 }
 0x363   :  { %v948_v35 = vpop.permute.xlu1 %947 }
 0x364   :  { %v536_v22 = vpop.xlane.xlu0 %535 }
 0x365   :  { %3775 = vrcp.f32 %v536_v22 }
 0x366   :  { %v3770_v24 = vpop.eup %3769 }
 0x367   :  { %v541_v28 = vmul.f32 %v3770_v24, %v3762_v1  ;;  %v1120_v38 = vpop.permute.xlu1 %1119 }
 0x368   :  { %v863_v32 = vpop.permute.xlu0 %862 }
 0x369   :  { %3507 = vmatmul.mubr.msk.f32.vlgmr.msra.gmra.mrb[2].mxu0 %vm547_vm5, %v541_v28 }
 0x36a   :  { %v3772_v29 = vpop.eup %3771  ;;  %3515 = vmatpush3.msk.msra.mxu0 %vm551_vm4, %v702_v14  ;;  %3516 = vmatprep.mubr.msk.f32.mxu0 %vm3831_vm0, %v3832_v4 }
 0x36b   :  { %v3774_v30 = vpop.eup %3773  ;;  %v543_v31 = vmul.f32 %v3772_v29, %v3764_v3  ;;  %3524 = vmatprep.subr.mxu0 %v3832_v4  ;;  %v1118_v40 = vpop.permute.xlu1 %1117 }
 0x36c   :  { %v542_v33 = vmul.f32 %v3774_v30, %v3766_v5  ;;  %v1035_v37 = vpop.permute.xlu0 %1034 }
 0x36d   :  { %3517 = vmatmul.mubr.msk.f32.vlgmr.msra.gmra.mrb[4].mxu0 %vm547_vm5, %v543_v31 }
 0x36e   :  { %3512 = vmatmul.mubr.msk.f32.vlgmr.msra.gmra.mrb[8].mxu1 %vm547_vm5, %v542_v33  ;;  %3526 = vmatprep.mubr.msk.f32.mxu0 %vm3831_vm0, %v3832_v4 }
 0x36f   :  { %v3776_v34 = vpop.eup %3775  ;;  %3520 = vmatpush3.msk.msra.mxu1 %vm551_vm4, %v779_v16  ;;  %3521 = vmatprep.mubr.msk.f32.mxu1 %vm3831_vm0, %v3832_v4 }
 0x370   :  { %v544_v36 = vmul.f32 %v3776_v34, %v3768_v8  ;;  %3529 = vmatprep.subr.mxu1 %v3832_v4  ;;  %v1033_v39 = vpop.permute.xlu0 %1032 }
 0x371   :  { %3525 = vmatpush3.xpose.msk.msra.mxu0 %vm176_vm2, %v865_v19 }
 0x372   :  { %3522 = vmatmul.mubr.msk.f32.vlgmr.msra.gmra.mrb[10].mxu1 %vm547_vm5, %v544_v36  ;;  %3534 = vmatprep.subr.mxu0 %v3832_v4 }
 0x373   :  { %3531 = vmatprep.mubr.msk.f32.mxu1 %vm3831_vm0, %v3832_v4 }
 0x374   :  { %3527 = vmatmul.mubr.msk.f32.vlgmr.msra.gmra.mrb[6].mxu0 %vm176_vm2, %v863_v32 }
 0x375   :  { %3535 = vmatpush3.xpose.msk.msra.mxu0 %vm176_vm2, %v1035_v37  ;;  %3536 = vmatprep.mubr.msk.f32.mxu0 %vm3831_vm0, %v3832_v4 }
 0x376   :  { %3530 = vmatpush3.xpose.msk.msra.mxu1 %vm176_vm2, %v950_v17  ;;  %3544 = vmatprep.subr.mxu0 %v3832_v4 }
 0x377   :  { %3539 = vmatprep.subr.mxu1 %v3832_v4 }
 0x378   :  { %3537 = vmatmul.mubr.msk.f32.vlgmr.msra.gmra.mrb[8].mxu0 %vm176_vm2, %v1033_v39 }
 0x379   :  { %3532 = vmatmul.mubr.msk.f32.vlgmr.msra.gmra.mrb[12].mxu1 %vm176_vm2, %v948_v35  ;;  %3546 = vmatprep.mubr.msk.f32.mxu0 %vm3831_vm0, %v3832_v4 }
 0x37a   :  { %3540 = vmatpush3.xpose.msk.msra.mxu1 %vm176_vm2, %v1120_v38  ;;  %3541 = vmatprep.mubr.msk.f32.mxu1 %vm3831_vm0, %v3832_v4 }
 0x37b   :  { %3549 = vmatprep.subr.mxu1 %v3832_v4 }
 0x37d   :  { %3542 = vmatmul.mubr.msk.f32.vlgmr.msra.gmra.mrb[14].mxu1 %vm176_vm2, %v1118_v40 }
 0x37e   :  { %3551 = vmatprep.mubr.msk.f32.mxu1 %vm3831_vm0, %v3832_v4 }
 0x43c   :  { %v620_v41 = vpop.f32.mrb[2].mxu0 }
 0x43d   :  { %v3508_v42 = vpop.f32.mrb[3].mxu0 }
 0x440   :  { %v774_v43 = vpop.f32.mrb[4].mxu0 }
 0x441   :  { %v697_v44 = vpop.f32.mrb[8].mxu1  ;;  %v3518_v45 = vpop.f32.mrb[5].mxu0 }
 0x442   :  { %v2879_v46 = vcombine.low %v620_v41, %v697_v44  ;;  %v3513_v47 = vpop.f32.mrb[9].mxu1 }
 0x444   :  { %v4086_v52 = vrot.slane %v2879_v46, %v3947_v15 }
 0x445   :  { %v851_v48 = vpop.f32.mrb[10].mxu1 }
 0x446   :  { %v2880_v49 = vcombine.low %v774_v43, %v851_v48  ;;  %v3523_v50 = vpop.f32.mrb[11].mxu1 }
 0x447   :  { %v936_v51 = vpop.f32.mrb[6].mxu0 }
 0x448   :  { %v4089_v53 = vrot.slane %v2880_v49, %v3947_v15  ;;  %v3528_v54 = vpop.f32.mrb[7].mxu0  ;;  %v1195_v55 = vsel %vm500_vm3, %v936_v51, -inf }
 0x449   :  { %1196 = vmax.xlane.f32.xlu0 %v1195_v55 }
 0x44a   :  { %v2895_v56 = vcombine.low %v4086_v52, %v4089_v53  ;;  %v3829_v52 = vld [vmem:[%s4395_s0] sm:$0xff] }
 0x44b   :  { %v1106_v57 = vpop.f32.mrb[8].mxu0 }
 0x44c   :  { %v1021_v58 = vpop.f32.mrb[12].mxu1  ;;  %v3538_v59 = vpop.f32.mrb[9].mxu0  ;;  %v1201_v60 = vsel %vm500_vm3, %v1106_v57, -inf }
 0x44d   :  { %v3533_v61 = vpop.f32.mrb[13].mxu1  ;;  %1202 = vmax.xlane.f32.xlu0 %v1201_v60  ;;  %v1198_v62 = vsel %vm500_vm3, %v1021_v58, -inf }
 0x44e   :  { %1199 = vmax.xlane.f32.xlu1 %v1198_v62 }
 0x450   :  { %v1191_v63 = vpop.f32.mrb[14].mxu1 }
 0x451   :  { %v3543_v1 = vpop.f32.mrb[15].mxu1  ;;  %v1204_v2 = vsel %vm500_vm3, %v1191_v63, -inf }
 0x452   :  { %1205 = vmax.xlane.f32.xlu0 %v1204_v2 }
 0x45f   :  { %1239 = vrot.lane.b32.xlu1 %v3952_v23, %s3838_s22 }
 0x463   :  { %1393 = vrot.lane.b32.xlu1 %v3955_v25, %s3838_s22 }
 0x467   :  { %1470 = vrot.lane.b32.xlu1 %v3963_v27, %s3838_s22 }
 0x468   :  { %1316 = vrot.lane.b32.xlu0 %v3960_v26, %s3838_s22 }
 0x46b   :  { %1627 = vrot.lane.b32.xlu1 %v3960_v26, %s3839_s23 }
 0x46c   :  { %1549 = vrot.lane.b32.xlu0 %v3952_v23, %s3839_s23 }
 0x4d6   :  { %v1197_v3 = vpop.xlane.xlu0 %1196 }
 0x4d7   :  { %v1207_v5 = vsub.f32 %v936_v51, %v1197_v3 }
 0x4d9   :  { %v1211_v6 = vmul.f32 1.442695, %v1207_v5 }
 0x4da   :  { %v1203_v7 = vpop.xlane.xlu0 %1202 }
 0x4db   :  { %3777 = vpow2.f32 %v1211_v6  ;;  %v1209_v8 = vsub.f32 %v1106_v57, %v1203_v7  ;;  %v1200_v9 = vpop.xlane.xlu1 %1199 }
 0x4dc   :  { %v1208_v14 = vsub.f32 %v1021_v58, %v1200_v9 }
 0x4dd   :  { %v1215_v16 = vmul.f32 1.442695, %v1209_v8 }
 0x4de   :  { %v1213_v17 = vmul.f32 1.442695, %v1208_v14 }
 0x4df   :  { %3779 = vpow2.f32 %v1215_v16  ;;  %v1240_v18 = vpop.permute.xlu1 %1239  ;;  %v1206_v19 = vpop.xlane.xlu0 %1205 }
 0x4e0   :  { %3781 = vpow2.f32 %v1213_v17  ;;  %v1210_v20 = vsub.f32 %v1191_v63, %v1206_v19  ;;  %3545 = vmatpush3.msk.msra.mxu0 %vm551_vm4, %v1240_v18 }
 0x4e1   :  { %3554 = vmatprep.subr.mxu0 %v3832_v4 }
 0x4e2   :  { %v1217_v21 = vmul.f32 1.442695, %v1210_v20 }
 0x4e3   :  { %v1317_v22 = vpop.permute.xlu0 %1316  ;;  %v1394_v35 = vpop.permute.xlu1 %1393 }
 0x4e4   :  { %3783 = vpow2.f32 %v1217_v21  ;;  %3550 = vmatpush3.msk.msra.mxu1 %vm551_vm4, %v1317_v22 }
 0x4e5   :  { %v3778_v24 = vpop.eup %3777  ;;  %3559 = vmatprep.subr.mxu1 %v3832_v4 }
 0x4e6   :  { %v1219_v28 = vsel %vm500_vm3, %v3778_v24, 0.0 }
 0x4e7   :  { %1220 = vadd.xlane.f32.xlu1 %v1219_v28  ;;  %v1471_v36 = vpop.permute.xlu1 %1470  ;;  %v1550_v39 = vpop.permute.xlu0 %1549 }
 0x4e9   :  { %v3780_v29 = vpop.eup %3779 }
 0x4ea   :  { %v3782_v30 = vpop.eup %3781  ;;  %v1225_v31 = vsel %vm500_vm3, %v3780_v29, 0.0 }
 0x4eb   :  { %1226 = vadd.xlane.f32.xlu1 %v1225_v31  ;;  %v1222_v32 = vsel %vm500_vm3, %v3782_v30, 0.0  ;;  %v1628_v37 = vpop.permute.xlu1 %1627 }
 0x4ec   :  { %1223 = vadd.xlane.f32.xlu0 %v1222_v32 }
 0x4ee   :  { %v3784_v33 = vpop.eup %3783 }
 0x4ef   :  { %v1228_v34 = vsel %vm500_vm3, %v3784_v33, 0.0 }
 0x4f0   :  { %1229 = vadd.xlane.f32.xlu0 %v1228_v34 }
 0x4fc   :  { %1625 = vrot.lane.b32.xlu1 %v4027_v10, %s3840_s24 }
 0x500   :  { %1783 = vrot.lane.b32.xlu1 %v3963_v27, %s3839_s23 }
 0x504   :  { %1781 = vrot.lane.b32.xlu1 %v4034_v11, %s3840_s24 }
 0x506   :  { %1547 = vrot.lane.b32.xlu0 %v4039_v12, %s3840_s24 }
 0x508   :  { %1903 = vrot.lane.b32.xlu1 %v3952_v23, %s3841_s25 }
 0x50a   :  { %1705 = vrot.lane.b32.xlu0 %v3955_v25, %s3839_s23 }
 0x50c   :  { %2057 = vrot.lane.b32.xlu1 %v3955_v25, %s3841_s25 }
 0x50e   :  { %1703 = vrot.lane.b32.xlu0 %v4046_v13, %s3840_s24 }
 0x510   :  { %2134 = vrot.lane.b32.xlu1 %v3963_v27, %s3841_s25 }
 0x512   :  { %1980 = vrot.lane.b32.xlu0 %v3960_v26, %s3841_s25 }
 0x574   :  { %v1221_v38 = vpop.xlane.xlu1 %1220 }
 0x575   :  { %3785 = vrcp.f32 %v1221_v38 }
 0x578   :  { %v1227_v40 = vpop.xlane.xlu1 %1226 }
 0x579   :  { %3787 = vrcp.f32 %v1227_v40  ;;  %v1224_v41 = vpop.xlane.xlu0 %1223 }
 0x57a   :  { %3789 = vrcp.f32 %v1224_v41 }
 0x57c   :  { %v1626_v44 = vpop.permute.xlu1 %1625 }
 0x57d   :  { %v1230_v42 = vpop.xlane.xlu0 %1229 }
 0x57e   :  { %3791 = vrcp.f32 %v1230_v42 }
 0x57f   :  { %v3786_v43 = vpop.eup %3785 }
 0x580   :  { %v1235_v45 = vmul.f32 %v3786_v43, %v3778_v24  ;;  %v1784_v51 = vpop.permute.xlu1 %1783 }
 0x581   :  { %v1548_v49 = vpop.permute.xlu0 %1547 }
 0x582   :  { %3547 = vmatmul.mubr.msk.f32.vlgmr.msra.gmra.mrb[10].mxu0 %vm547_vm5, %v1235_v45 }
 0x583   :  { %v3788_v46 = vpop.eup %3787  ;;  %3555 = vmatpush3.msk.msra.mxu0 %vm551_vm4, %v1394_v35  ;;  %3556 = vmatprep.mubr.msk.f32.mxu0 %vm3831_vm0, %v3832_v4 }
 0x584   :  { %v3790_v47 = vpop.eup %3789  ;;  %v1237_v48 = vmul.f32 %v3788_v46, %v3780_v29  ;;  %3564 = vmatprep.subr.mxu0 %v3832_v4  ;;  %v1782_v58 = vpop.permute.xlu1 %1781 }
 0x585   :  { %v1236_v50 = vmul.f32 %v3790_v47, %v3782_v30  ;;  %v1706_v57 = vpop.permute.xlu0 %1705 }
 0x586   :  { %3557 = vmatmul.mubr.msk.f32.vlgmr.msra.gmra.mrb[12].mxu0 %vm547_vm5, %v1237_v48 }
 0x587   :  { %3552 = vmatmul.mubr.msk.f32.vlgmr.msra.gmra.mrb[16].mxu1 %vm547_vm5, %v1236_v50  ;;  %3566 = vmatprep.mubr.msk.f32.mxu0 %vm3831_vm0, %v3832_v4 }
 0x588   :  { %v3792_v54 = vpop.eup %3791  ;;  %3560 = vmatpush3.msk.msra.mxu1 %vm551_vm4, %v1471_v36  ;;  %3561 = vmatprep.mubr.msk.f32.mxu1 %vm3831_vm0, %v3832_v4  ;;  %v1904_v60 = vpop.permute.xlu1 %1903 }
 0x589   :  { %v1238_v55 = vmul.f32 %v3792_v54, %v3784_v33  ;;  %3569 = vmatprep.subr.mxu1 %v3832_v4  ;;  %v1704_v59 = vpop.permute.xlu0 %1703 }
 0x58a   :  { %3565 = vmatpush3.xpose.msk.msra.mxu0 %vm176_vm2, %v1550_v39 }
 0x58b   :  { %3562 = vmatmul.mubr.msk.f32.vlgmr.msra.gmra.mrb[18].mxu1 %vm547_vm5, %v1238_v55  ;;  %3574 = vmatprep.subr.mxu0 %v3832_v4 }
 0x58c   :  { %3571 = vmatprep.mubr.msk.f32.mxu1 %vm3831_vm0, %v3832_v4  ;;  %v2058_v34 = vpop.permute.xlu1 %2057 }
 0x58d   :  { %3567 = vmatmul.mubr.msk.f32.vlgmr.msra.gmra.mrb[14].mxu0 %vm176_vm2, %v1548_v49  ;;  %v1981_v61 = vpop.permute.xlu0 %1980 }
 0x58e   :  { %3575 = vmatpush3.xpose.msk.msra.mxu0 %vm176_vm2, %v1706_v57  ;;  %3576 = vmatprep.mubr.msk.f32.mxu0 %vm3831_vm0, %v3832_v4 }
 0x58f   :  { %3570 = vmatpush3.xpose.msk.msra.mxu1 %vm176_vm2, %v1628_v37  ;;  %3584 = vmatprep.subr.mxu0 %v3832_v4 }
 0x590   :  { %3579 = vmatprep.subr.mxu1 %v3832_v4  ;;  %v2135_v36 = vpop.permute.xlu1 %2134 }
 0x591   :  { %3577 = vmatmul.mubr.msk.f32.vlgmr.msra.gmra.mrb[16].mxu0 %vm176_vm2, %v1704_v59 }
 0x592   :  { %3572 = vmatmul.mubr.msk.f32.vlgmr.msra.gmra.mrb[20].mxu1 %vm176_vm2, %v1626_v44  ;;  %3585 = vmatpush3.msk.msra.mxu0 %vm551_vm4, %v1904_v60 }
 0x593   :  { %3580 = vmatpush3.xpose.msk.msra.mxu1 %vm176_vm2, %v1784_v51  ;;  %3581 = vmatprep.mubr.msk.f32.mxu1 %vm3831_vm0, %v3832_v4 }
 0x594   :  { %3589 = vmatprep.subr.mxu1 %v3832_v4  ;;  %3586 = vmatprep.mubr.msk.f32.mxu0 %vm3831_vm0, %v3832_v4 }
 0x595   :  { %3594 = vmatprep.subr.mxu0 %v3832_v4 }
 0x596   :  { %3582 = vmatmul.mubr.msk.f32.vlgmr.msra.gmra.mrb[22].mxu1 %vm176_vm2, %v1782_v58 }
 0x597   :  { %3590 = vmatpush3.msk.msra.mxu1 %vm551_vm4, %v1981_v61  ;;  %3591 = vmatprep.mubr.msk.f32.mxu1 %vm3831_vm0, %v3832_v4 }
 0x598   :  { %3599 = vmatprep.subr.mxu1 %v3832_v4 }
 0x655   :  { %v1312_v62 = vpop.f32.mrb[10].mxu0 }
 0x656   :  { %v3548_v63 = vpop.f32.mrb[11].mxu0 }
 0x659   :  { %v1466_v1 = vpop.f32.mrb[12].mxu0 }
 0x65a   :  { %v1389_v2 = vpop.f32.mrb[16].mxu1  ;;  %v3558_v3 = vpop.f32.mrb[13].mxu0 }
 0x65b   :  { %v2901_v5 = vcombine.low %v1312_v62, %v1389_v2  ;;  %v3553_v6 = vpop.f32.mrb[17].mxu1 }
 0x65d   :  { %v4166_v16 = vrot.slane %v2901_v5, %v3947_v15 }
 0x65e   :  { %v1543_v7 = vpop.f32.mrb[18].mxu1 }
 0x65f   :  { %v2902_v8 = vcombine.low %v1466_v1, %v1543_v7  ;;  %v3563_v9 = vpop.f32.mrb[19].mxu1 }
 0x660   :  { %v1621_v14 = vpop.f32.mrb[14].mxu0 }
 0x661   :  { %v4169_v17 = vrot.slane %v2902_v8, %v3947_v15  ;;  %v3568_v18 = vpop.f32.mrb[15].mxu0  ;;  %v1859_v19 = vsel %vm500_vm3, %v1621_v14, -inf }
 0x662   :  { %1860 = vmax.xlane.f32.xlu0 %v1859_v19 }
 0x663   :  { %v2917_v20 = vcombine.low %v4166_v16, %v4169_v17 }
 0x664   :  { %v1777_v21 = vpop.f32.mrb[16].mxu0 }
 0x665   :  { %v1699_v22 = vpop.f32.mrb[20].mxu1  ;;  %v3578_v24 = vpop.f32.mrb[17].mxu0  ;;  %v1865_v28 = vsel %vm500_vm3, %v1777_v21, -inf }
 0x666   :  { %v3573_v29 = vpop.f32.mrb[21].mxu1  ;;  %1866 = vmax.xlane.f32.xlu0 %v1865_v28  ;;  %v1862_v30 = vsel %vm500_vm3, %v1699_v22, -inf }
 0x667   :  { %1863 = vmax.xlane.f32.xlu1 %v1862_v30 }
 0x669   :  { %v1855_v31 = vpop.f32.mrb[22].mxu1 }
 0x66a   :  { %v3583_v32 = vpop.f32.mrb[23].mxu1  ;;  %v1868_v33 = vsel %vm500_vm3, %v1855_v31, -inf }
 0x66b   :  { %1869 = vmax.xlane.f32.xlu0 %v1868_v33 }
 0x678   :  { %2291 = vrot.lane.b32.xlu1 %v3960_v26, %s3842_s26 }
 0x681   :  { %2213 = vrot.lane.b32.xlu0 %v3952_v23, %s3842_s26 }
 0x6ef   :  { %v1861_v35 = vpop.xlane.xlu0 %1860 }
 0x6f0   :  { %v1871_v37 = vsub.f32 %v1621_v14, %v1861_v35 }
 0x6f2   :  { %v1875_v38 = vmul.f32 1.442695, %v1871_v37 }
 0x6f3   :  { %v1867_v46 = vpop.xlane.xlu0 %1866 }
 0x6f4   :  { %3793 = vpow2.f32 %v1875_v38  ;;  %v1864_v39 = vpop.xlane.xlu1 %1863  ;;  %v1873_v47 = vsub.f32 %v1777_v21, %v1867_v46 }
 0x6f5   :  { %v1872_v40 = vsub.f32 %v1699_v22, %v1864_v39 }
 0x6f6   :  { %v1879_v49 = vmul.f32 1.442695, %v1873_v47 }
 0x6f7   :  { %v1877_v41 = vmul.f32 1.442695, %v1872_v40 }
 0x6f8   :  { %v1870_v48 = vpop.xlane.xlu0 %1869 }
 0x6f9   :  { %3795 = vpow2.f32 %v1877_v41  ;;  %v1874_v50 = vsub.f32 %v1855_v31, %v1870_v48 }
 0x6fa   :  { %3797 = vpow2.f32 %v1879_v49 }
 0x6fb   :  { %v1881_v51 = vmul.f32 1.442695, %v1874_v50 }
 0x6fc   :  { %v2214_v59 = vpop.permute.xlu0 %2213 }
 0x6fd   :  { %3799 = vpow2.f32 %v1881_v51 }
 0x6fe   :  { %v3794_v42 = vpop.eup %3793 }
 0x6ff   :  { %v1883_v43 = vsel %vm500_vm3, %v3794_v42, 0.0 }
 0x700   :  { %1884 = vadd.xlane.f32.xlu1 %v1883_v43 }
 0x703   :  { %v3796_v44 = vpop.eup %3795 }
 0x704   :  { %v1886_v45 = vsel %vm500_vm3, %v3796_v44, 0.0  ;;  %v3798_v54 = vpop.eup %3797 }
 0x705   :  { %1887 = vadd.xlane.f32.xlu0 %v1886_v45  ;;  %v1889_v55 = vsel %vm500_vm3, %v3798_v54, 0.0 }
 0x707   :  { %v3800_v57 = vpop.eup %3799 }
 0x708   :  { %v1892_v58 = vsel %vm500_vm3, %v3800_v57, 0.0 }
 0x711   :  { %2289 = vrot.lane.b32.xlu1 %v4027_v10, %s3843_s27  ;;  %v2292_v10 = vpop.permute.xlu1 %2291 }
 0x71b   :  { %2211 = vrot.lane.b32.xlu0 %v4039_v12, %s3843_s27 }
 0x735   :  { %1890 = vadd.xlane.f32.xlu1 %v1889_v55 }
 0x73a   :  { %1893 = vadd.xlane.f32.xlu0 %v1892_v58 }
 0x746   :  { %2447 = vrot.lane.b32.xlu1 %v3963_v27, %s3842_s26 }
 0x74a   :  { %2445 = vrot.lane.b32.xlu1 %v4034_v11, %s3843_s27 }
 0x750   :  { %2369 = vrot.lane.b32.xlu0 %v3955_v25, %s3842_s26 }
 0x754   :  { %2367 = vrot.lane.b32.xlu0 %v4046_v13, %s3843_s27 }
 0x78d   :  { %v1885_v12 = vpop.xlane.xlu1 %1884 }
 0x78e   :  { %3801 = vrcp.f32 %v1885_v12 }
 0x791   :  { %v2290_v13 = vpop.permute.xlu1 %2289 }
 0x792   :  { %v1888_v60 = vpop.xlane.xlu0 %1887 }
 0x793   :  { %3803 = vrcp.f32 %v1888_v60 }
 0x796   :  { %v2212_v2 = vpop.permute.xlu0 %2211 }
 0x798   :  { %v3802_v61 = vpop.eup %3801 }
 0x799   :  { %v1899_v62 = vmul.f32 %v3802_v61, %v3794_v42 }
 0x79b   :  { %3587 = vmatmul.mubr.msk.f32.vlgmr.msra.gmra.mrb[18].mxu0 %vm547_vm5, %v1899_v62 }
 0x79c   :  { %3595 = vmatpush3.msk.msra.mxu0 %vm551_vm4, %v2058_v34  ;;  %3596 = vmatprep.mubr.msk.f32.mxu0 %vm3831_vm0, %v3832_v4 }
 0x79d   :  { %v3804_v11 = vpop.eup %3803  ;;  %3604 = vmatprep.subr.mxu0 %v3832_v4 }
 0x79e   :  { %v1900_v63 = vmul.f32 %v3804_v11, %v3796_v44 }
 0x7a0   :  { %3592 = vmatmul.mubr.msk.f32.vlgmr.msra.gmra.mrb[24].mxu1 %vm547_vm5, %v1900_v63 }
 0x7a1   :  { %3600 = vmatpush3.msk.msra.mxu1 %vm551_vm4, %v2135_v36  ;;  %3601 = vmatprep.mubr.msk.f32.mxu1 %vm3831_vm0, %v3832_v4 }
 0x7a2   :  { %3609 = vmatprep.subr.mxu1 %v3832_v4 }
 0x7c2   :  { %v1891_v1 = vpop.xlane.xlu1 %1890 }
 0x7c3   :  { %3805 = vrcp.f32 %v1891_v1 }
 0x7c6   :  { %v2448_v14 = vpop.permute.xlu1 %2447 }
 0x7c7   :  { %v1894_v3 = vpop.xlane.xlu0 %1893 }
 0x7c8   :  { %3807 = vrcp.f32 %v1894_v3 }
 0x7ca   :  { %v2446_v19 = vpop.permute.xlu1 %2445 }
 0x7cb   :  { %v2370_v7 = vpop.permute.xlu0 %2369 }
 0x7cd   :  { %v3806_v5 = vpop.eup %3805 }
 0x7ce   :  { %v1901_v6 = vmul.f32 %v3806_v5, %v3798_v54 }
 0x7cf   :  { %v2368_v18 = vpop.permute.xlu0 %2367 }
 0x7d0   :  { %3597 = vmatmul.mubr.msk.f32.vlgmr.msra.gmra.mrb[20].mxu0 %vm547_vm5, %v1901_v6 }
 0x7d1   :  { %3605 = vmatpush3.xpose.msk.msra.mxu0 %vm176_vm2, %v2214_v59  ;;  %3606 = vmatprep.mubr.msk.f32.mxu0 %vm3831_vm0, %v3832_v4 }
 0x7d2   :  { %v3808_v8 = vpop.eup %3807  ;;  %3614 = vmatprep.subr.mxu0 %v3832_v4 }
 0x7d3   :  { %v1902_v9 = vmul.f32 %v3808_v8, %v3800_v57 }
 0x7d4   :  { %3607 = vmatmul.mubr.msk.f32.vlgmr.msra.gmra.mrb[22].mxu0 %vm176_vm2, %v2212_v2 }
 0x7d5   :  { %3602 = vmatmul.mubr.msk.f32.vlgmr.msra.gmra.mrb[26].mxu1 %vm547_vm5, %v1902_v9  ;;  %3615 = vmatpush3.xpose.msk.msra.mxu0 %vm176_vm2, %v2370_v7 }
 0x7d6   :  { %3610 = vmatpush3.xpose.msk.msra.mxu1 %vm176_vm2, %v2292_v10  ;;  %3611 = vmatprep.mubr.msk.f32.mxu1 %vm3831_vm0, %v3832_v4 }
 0x7d7   :  { %3616 = vmatprep.mubr.msk.f32.mxu0 %vm3831_vm0, %v3832_v4  ;;  %3619 = vmatprep.subr.mxu1 %v3832_v4 }
 0x7d8   :  { %3617 = vmatmul.mubr.msk.f32.vlgmr.msra.gmra.mrb[24].mxu0 %vm176_vm2, %v2368_v18  ;;  %3624 = vmatprep.subr.mxu0 %v3832_v4 }
 0x7d9   :  { %3612 = vmatmul.mubr.msk.f32.vlgmr.msra.gmra.mrb[28].mxu1 %vm176_vm2, %v2290_v13  ;;  %3626 = vmatprep.mubr.msk.f32.mxu0 %vm3831_vm0, %v3832_v4 }
 0x7da   :  { %3620 = vmatpush3.xpose.msk.msra.mxu1 %vm176_vm2, %v2448_v14  ;;  %3621 = vmatprep.mubr.msk.f32.mxu1 %vm3831_vm0, %v3832_v4 }
 0x7db   :  { %3629 = vmatprep.subr.mxu1 %v3832_v4 }
 0x7dd   :  { %3622 = vmatmul.mubr.msk.f32.vlgmr.msra.gmra.mrb[30].mxu1 %vm176_vm2, %v2446_v19 }
 0x7de   :  { %3631 = vmatprep.mubr.msk.f32.mxu1 %vm3831_vm0, %v3832_v4 }
 0x86e   :  { %v1976_v21 = vpop.f32.mrb[18].mxu0 }
 0x86f   :  { %v3588_v22 = vpop.f32.mrb[19].mxu0 }
 0x873   :  { %v2053_v24 = vpop.f32.mrb[24].mxu1 }
 0x874   :  { %v2925_v28 = vcombine.low %v1976_v21, %v2053_v24  ;;  %v3593_v29 = vpop.f32.mrb[25].mxu1 }
 0x875   :  { %v2975_v29 = vld [vmem:[%s4397_s3 + $0x8] sm:$0xff] }
 0x876   :  { %v2933_v38 = vrot.slane %v2925_v28, %v3947_v15  ;;  %v2974_v28 = vld [vmem:[%s4397_s3] sm:$0xff] }
 0x8a3   :  { %v2130_v30 = vpop.f32.mrb[20].mxu0 }
 0x8a4   :  { %v3598_v31 = vpop.f32.mrb[21].mxu0 }
 0x8a5   :  { %v3708_v31 = vpack.c.bf16 %v2975_v29, %v2974_v28 }
 0x8a7   :  { %v2285_v32 = vpop.f32.mrb[22].mxu0 }
 0x8a8   :  { %v2207_v33 = vpop.f32.mrb[26].mxu1  ;;  %v3608_v34 = vpop.f32.mrb[23].mxu0  ;;  %v2523_v35 = vsel %vm500_vm3, %v2285_v32, -inf }
 0x8a9   :  { %v2926_v36 = vcombine.low %v2130_v30, %v2207_v33  ;;  %v3603_v37 = vpop.f32.mrb[27].mxu1  ;;  %2524 = vmax.xlane.f32.xlu0 %v2523_v35  ;;  %v2976_v30 = vld [vmem:[%s4397_s3 + $0x10] sm:$0xff] }
 0x8ab   :  { %v2940_v39 = vrot.slane %v2926_v36, %v3947_v15  ;;  %v2441_v40 = vpop.f32.mrb[24].mxu0 }
 0x8ac   :  { %v2363_v41 = vpop.f32.mrb[28].mxu1  ;;  %v3618_v42 = vpop.f32.mrb[25].mxu0  ;;  %v2529_v43 = vsel %vm500_vm3, %v2441_v40, -inf }
 0x8ad   :  { %v3613_v44 = vpop.f32.mrb[29].mxu1  ;;  %2530 = vmax.xlane.f32.xlu0 %v2529_v43  ;;  %v2526_v45 = vsel %vm500_vm3, %v2363_v41, -inf  ;;  %v2941_v46 = vcombine.low %v2933_v38, %v2940_v39 }
 0x8ae   :  { %2527 = vmax.xlane.f32.xlu1 %v2526_v45 }
 0x8b0   :  { %v2519_v47 = vpop.f32.mrb[30].mxu1 }
 0x8b1   :  { %v3623_v48 = vpop.f32.mrb[31].mxu1  ;;  %v2532_v49 = vsel %vm500_vm3, %v2519_v47, -inf }
 0x8b2   :  { %2533 = vmax.xlane.f32.xlu0 %v2532_v49 }
 0x8bf   :  { %2567 = vrot.lane.b32.xlu1 %v3952_v23, %s3844_s28 }
 0x936   :  { %v2525_v50 = vpop.xlane.xlu0 %2524 }
 0x937   :  { %v2535_v51 = vsub.f32 %v2285_v32, %v2525_v50  ;;  %v2977_v32 = vld [vmem:[%s4397_s3 + $0x18] sm:$0xff]  ;;  %s3847_s3 = smov 24  }
 0x938   :  { %v3711_v33 = vpack.c.bf16 %v2977_v32, %v2976_v30 }
 0x939   :  { %v2539_v54 = vmul.f32 1.442695, %v2535_v51 }
 0x93a   :  { %v2531_v55 = vpop.xlane.xlu0 %2530 }
 0x93b   :  { %3809 = vpow2.f32 %v2539_v54  ;;  %v2537_v57 = vsub.f32 %v2441_v40, %v2531_v55  ;;  %v2528_v58 = vpop.xlane.xlu1 %2527 }
 0x93c   :  { %v2536_v10 = vsub.f32 %v2363_v41, %v2528_v58 }
 0x93d   :  { %v2543_v12 = vmul.f32 1.442695, %v2537_v57 }
 0x93e   :  { %v2541_v59 = vmul.f32 1.442695, %v2536_v10 }
 0x93f   :  { %3811 = vpow2.f32 %v2543_v12  ;;  %v2568_v60 = vpop.permute.xlu1 %2567  ;;  %v2534_v61 = vpop.xlane.xlu0 %2533 }
 0x940   :  { %3813 = vpow2.f32 %v2541_v59  ;;  %v2538_v62 = vsub.f32 %v2519_v47, %v2534_v61  ;;  %3625 = vmatpush3.msk.msra.mxu0 %vm551_vm4, %v2568_v60  ;;  %v3089_v61 = vld [vmem:[%s4399_s7] sm:$0xff] }
 0x941   :  { %3634 = vmatprep.subr.mxu0 %v3832_v4 }
 0x942   :  { %v2545_v23 = vmul.f32 1.442695, %v2538_v62  ;;  %v3090_v62 = vld [vmem:[%s4399_s7 + $0x8] sm:$0xff] }
 0x944   :  { %3815 = vpow2.f32 %v2545_v23  ;;  %v3714_v23 = vpack.c.bf16 %v3090_v62, %v3089_v61 }
 0x945   :  { %v3810_v11 = vpop.eup %3809 }
 0x946   :  { %v2547_v63 = vsel %vm500_vm3, %v3810_v11, 0.0 }
 0x947   :  { %2548 = vadd.xlane.f32.xlu1 %v2547_v63  ;;  %v3092_v63 = vld [vmem:[%s4399_s7 + $0x18] sm:$0xff] }
 0x949   :  { %v3812_v13 = vpop.eup %3811 }
 0x94a   :  { %v3814_v1 = vpop.eup %3813  ;;  %v2553_v2 = vsel %vm500_vm3, %v3812_v13, 0.0 }
 0x94b   :  { %2554 = vadd.xlane.f32.xlu1 %v2553_v2  ;;  %v2550_v3 = vsel %vm500_vm3, %v3814_v1, 0.0  ;;  %v3175_v2 = vld [vmem:[%s4400_s9 + $0x8] sm:$0xff] }
 0x94c   :  { %2551 = vadd.xlane.f32.xlu0 %v2550_v3  ;;  %v3176_v3 = vld [vmem:[%s4400_s9 + $0x10] sm:$0xff] }
 0x94e   :  { %v3816_v5 = vpop.eup %3815 }
 0x94f   :  { %v2556_v6 = vsel %vm500_vm3, %v3816_v5, 0.0 }
 0x950   :  { %2557 = vadd.xlane.f32.xlu0 %v2556_v6  ;;  %v3177_v6 = vld [vmem:[%s4400_s9 + $0x18] sm:$0xff] }
 0x95c   :  { %2721 = vrot.lane.b32.xlu1 %v3955_v25, %s3844_s28 }
 0x960   :  { %2798 = vrot.lane.b32.xlu1 %v3963_v27, %s3844_s28 }
 0x964   :  { %2942 = vrot.lane.b32.xlu1 %v2941_v46, %s3845_s29 }
 0x966   :  { %2644 = vrot.lane.b32.xlu0 %v3960_v26, %s3844_s28 }
 0x96a   :  { %2918 = vrot.lane.b32.xlu0 %v2917_v20, %s3846_s30 }
 0x9d4   :  { %v2549_v7 = vpop.xlane.xlu1 %2548 }
 0x9d5   :  { %3817 = vrcp.f32 %v2549_v7  ;;  %v3723_v7 = vpack.c.bf16 %v3177_v6, %v3176_v3 }
 0x9d8   :  { %v2555_v8 = vpop.xlane.xlu1 %2554 }
 0x9d9   :  { %3819 = vrcp.f32 %v2555_v8  ;;  %v2552_v9 = vpop.xlane.xlu0 %2551  ;;  %v3178_v8 = vld [vmem:[%s4400_s9 + $0x20] sm:$0xff] }
 0x9da   :  { %3821 = vrcp.f32 %v2552_v9  ;;  %v3179_v9 = vld [vmem:[%s4400_s9 + $0x28] sm:$0xff] }
 0x9dc   :  { %v2722_v18 = vpop.permute.xlu1 %2721 }
 0x9dd   :  { %v2558_v25 = vpop.xlane.xlu0 %2557 }
 0x9de   :  { %3823 = vrcp.f32 %v2558_v25  ;;  %v3726_v25 = vpack.c.bf16 %v3179_v9, %v3178_v8 }
 0x9df   :  { %v3818_v14 = vpop.eup %3817 }
 0x9e0   :  { %v2563_v27 = vmul.f32 %v3818_v14, %v3810_v11  ;;  %v2799_v21 = vpop.permute.xlu1 %2798  ;;  %v3091_v11 = vld [vmem:[%s4399_s7 + $0x10] sm:$0xff] }
 0x9e1   :  { %v2645_v19 = vpop.permute.xlu0 %2644  ;;  %v3180_v14 = vld [vmem:[%s4400_s9 + $0x30] sm:$0xff] }
 0x9e2   :  { %3630 = vmatpush3.msk.msra.mxu1 %vm551_vm4, %v2645_v19  ;;  %3627 = vmatmul.mubr.msk.f32.vlgmr.msra.gmra.mrb[26].mxu0 %vm547_vm5, %v2563_v27  ;;  %v3181_v27 = vld [vmem:[%s4400_s9 + $0x38] sm:$0xff]  ;;  %v3182_v19 = vld [vmem:[%s4400_s9 + $0x40] sm:$0xff] }
 0x9e3   :  { %v3820_v26 = vpop.eup %3819  ;;  %3635 = vmatpush3.msk.msra.mxu0 %vm551_vm4, %v2722_v18  ;;  %3636 = vmatprep.mubr.msk.f32.mxu0 %vm3831_vm0, %v3832_v4  ;;  %v3729_v18 = vpack.c.bf16 %v3181_v27, %v3180_v14 }
 0x9e4   :  { %v3822_v16 = vpop.eup %3821  ;;  %v2565_v17 = vmul.f32 %v3820_v26, %v3812_v13  ;;  %3639 = vmatprep.subr.mxu1 %v3832_v4  ;;  %3719 = vmatprep.subr.bf16.mxu0 %v3830_v0  ;;  %v2943_v48 = vpop.permute.xlu1 %2942  ;;  %v3717_v13 = vpack.c.bf16 %v3092_v63, %v3091_v11  ;;  %v3183_v26 = vld [vmem:[%s4400_s9 + $0x48] sm:$0xff] }
 0x9e5   :  { %v2564_v20 = vmul.f32 %v3822_v16, %v3814_v1  ;;  %v2919_v47 = vpop.permute.xlu0 %2918  ;;  %v3174_v1 = vld [vmem:[%s4400_s9] sm:$0xff]  ;;  %v3732_v16 = vpack.c.bf16 %v3183_v26, %v3182_v19 }
 0x9e6   :  { %3637 = vmatmul.mubr.msk.f32.vlgmr.msra.gmra.mrb[28].mxu0 %vm547_vm5, %v2565_v17  ;;  %v2969_v49 = vsel %vm176_vm2, %v2895_v56, %v2919_v47  ;;  %v3184_v17 = vld [vmem:[%s4400_s9 + $0x50] sm:$0xff] }
 0x9e7   :  { %3632 = vmatmul.mubr.msk.f32.vlgmr.msra.gmra.mrb[32].mxu1 %vm547_vm5, %v2564_v20  ;;  %3698 = vmatprep.mubr.msk.f32.mxu0 %vm3831_vm0, %v3832_v4  ;;  %v2971_v50 = vsel %vm2970_vm6, %v2969_v49, %v2943_v48  ;;  %v3185_v20 = vld [vmem:[%s4400_s9 + $0x58] sm:$0xff] }
 0x9e8   :  { %v3824_v22 = vpop.eup %3823  ;;  %3640 = vmatpush3.msk.msra.mxu1 %vm551_vm4, %v2799_v21  ;;  %3641 = vmatprep.mubr.msk.f32.mxu1 %vm3831_vm0, %v3832_v4  ;;  %v3735_v21 = vpack.c.bf16 %v3185_v20, %v3184_v17 }
 0x9e9   :  { %v2566_v24 = vmul.f32 %v3824_v22, %v3816_v5  ;;  %3707 = vmatprep.subr.bf16.mxu1 %v3830_v0  ;;  %v3720_v5 = vpack.c.bf16 %v3175_v2, %v3174_v1  ;;  %v3186_v22 = vld [vmem:[%s4400_s9 + $0x60] sm:$0xff] }
 0x9eb   :  { %3642 = vmatmul.mubr.msk.f32.vlgmr.msra.gmra.mrb[34].mxu1 %vm547_vm5, %v2566_v24  ;;  %3721 = vmatpush3.bf16.msra.mxu0 %v3720_v5  ;;  %v3187_v24 = vld [vmem:[%s4400_s9 + $0x68] sm:$0xff] }
 0x9ec   :  { %3652 = vmatprep.mubr.msk.f32.mxu1 %vm3831_vm0, %v3832_v4  ;;  %3709 = vmatpush3.bf16.msra.mxu1 %v3708_v31  ;;  %v3738_v28 = vpack.c.bf16 %v3187_v24, %v3186_v22 }
 0x9ed   :  { %3710 = vmatprep.subr.bf16.mxu1 %v3830_v0  ;;  %3722 = vmatprep.subr.bf16.mxu0 %v3830_v0 }
 0x9ef   :  { %3724 = vmatpush3.bf16.msra.mxu0 %v3723_v7 }
 0x9f0   :  { %3712 = vmatpush3.bf16.msra.mxu1 %v3711_v33  ;;  %3725 = vmatprep.subr.bf16.mxu0 %v3830_v0  ;;  %v3370_v33 = vld [vmem:[%s4401_s5] ss:$0 sm:$0xff] }
 0x9f1   :  { %3713 = vmatprep.subr.bf16.mxu1 %v3830_v0 }
 0x9f3   :  { %3727 = vmatpush3.bf16.msra.mxu0 %v3726_v25 }
 0x9f4   :  { %3728 = vmatprep.subr.bf16.mxu0 %v3830_v0 }
 0x9f7   :  { %3730 = vmatpush3.bf16.msra.mxu0 %v3729_v18 }
 0x9f8   :  { %3731 = vmatprep.subr.bf16.mxu0 %v3830_v0 }
 0x9fb   :  { %3733 = vmatpush3.bf16.msra.mxu0 %v3732_v16 }
 0x9fc   :  { %3734 = vmatprep.subr.bf16.mxu0 %v3830_v0 }
 0x9ff   :  { %3736 = vmatpush3.bf16.msra.mxu0 %v3735_v21 }
 0xa00   :  { %3737 = vmatprep.subr.bf16.mxu0 %v3830_v0 }
 0xa03   :  { %3739 = vmatpush3.bf16.msra.mxu0 %v3738_v28 }
 0xa04   :  { %3740 = vmatprep.subr.bf16.mxu0 %v3830_v0 }
 0xab5   :  { %v2640_v34 = vpop.f32.mrb[26].mxu0 }
 0xab6   :  { %v3628_v35 = vpop.f32.mrb[27].mxu0 }
 0xab7   :  { %v3371_v35 = vld [vmem:[%s4402_s6] ss:$0 sm:$0xff] }
 0xab9   :  { %v2794_v36 = vpop.f32.mrb[28].mxu0 }
 0xaba   :  { %v2717_v37 = vpop.f32.mrb[32].mxu1  ;;  %v3638_v38 = vpop.f32.mrb[29].mxu0 }
 0xabb   :  { %v2949_v39 = vcombine.low %v2640_v34, %v2717_v37  ;;  %v3633_v40 = vpop.f32.mrb[33].mxu1  ;;  %v3189_v38 = vld [vmem:[%s4400_s9 + $0x78] sm:$0xff] }
 0xabc   :  { %v3372_v40 = vld [vmem:[%s4403_s8] ss:$0 sm:$0xff] }
 0xabd   :  { %v2957_v44 = vrot.slane %v2949_v39, %v3947_v15 }
 0xabe   :  { %v2871_v41 = vpop.f32.mrb[34].mxu1 }
 0xabf   :  { %v2950_v42 = vcombine.low %v2794_v36, %v2871_v41  ;;  %v3643_v43 = vpop.f32.mrb[35].mxu1 }
 0xac1   :  { %v2964_v45 = vrot.slane %v2950_v42, %v3947_v15  ;;  %v3368_v15 = vld [vmem:[%s4398_s4] ss:$0 sm:$0xff] }
 0xac3   :  { %v2965_v46 = vcombine.low %v2957_v44, %v2964_v45  ;;  %v3374_v45 = vld [vmem:[%s4404_s10] ss:$0 sm:$0xff] }
 0xac5   :  { %2966 = vrot.lane.b32.xlu0 %v2965_v46, %s3847_s3 }
 0xb37   :  { %v2967_v51 = vpop.permute.xlu0 %2966 }
 0xb38   :  { %v2973_v54 = vsel %vm2972_vm7, %v2971_v50, %v2967_v51 }
 0xb39   :  { %3653 = vmatmul.mubr.msk.f32.vlgmr.msra.gmra.mrb[36].mxu1 %vm56_vm1, %v2973_v54 }
 0xb3a   :  { %3663 = vmatprep.mubr.msk.f32.mxu1 %vm3831_vm0, %v3832_v4  ;;  %3715 = vmatpush3.bf16.msra.mxu1 %v3714_v23 }
 0xb3b   :  { %3716 = vmatprep.subr.bf16.mxu1 %v3830_v0  ;;  %v3188_v0 = vld [vmem:[%s4400_s9 + $0x70] sm:$0xff] }
 0xb3c   :  { %v3741_v39 = vpack.c.bf16 %v3189_v38, %v3188_v0 }
 0xb3e   :  { %3718 = vmatpush3.bf16.msra.mxu1 %v3717_v13  ;;  %3742 = vmatpush3.bf16.msra.mxu0 %v3741_v39 }
 0xc0c   :  { %v3054_v55 = vpop.f32.mrb[36].mxu1 }
 0xc0d   :  { %v3055_v57 = vadd.f32 %v3368_v15, %v3054_v55  ;;  %v3654_v58 = vpop.f32.mrb[37].mxu1 }
 0xc0f   :  { %v3058_v53 = vadd.f32 %v3829_v52, %v3055_v57 }
 0xc11   :  { %v3059_v56 = vsel %vm56_vm1, %v3058_v53, 0.0 }
 0xc12   :  { %3060 = vadd.xlane.f32.xlu1 %v3059_v56 }
 0xc9f   :  { %v3061_v10 = vpop.xlane.xlu1 %3060 }
 0xca0   :  { %v3063_v12 = vmul.f32 0.03125, %v3061_v10  ;;  %v3375_v10 = vld [vmem:[%s4405_s11] ss:$0 sm:$0xff] }
 0xca2   :  { %v3064_v59 = vsub.f32 %v3058_v53, %v3063_v12 }
 0xca4   :  { %v3065_v60 = vmul.f32 %v3064_v59, %v3064_v59 }
 0xca6   :  { %v3066_v4 = vsel %vm56_vm1, %v3065_v60, 0.0 }
 0xca7   :  { %3067 = vadd.xlane.f32.xlu0 %v3066_v4 }
 0xd34   :  { %v3068_v29 = vpop.xlane.xlu0 %3067 }
 0xd35   :  { %v3069_v30 = vmul.f32 0.03125, %v3068_v29 }
 0xd37   :  { %v3070_v31 = vadd.f32 1e-05, %v3069_v30 }
 0xd39   :  { %3825 = vrsqrt.f32 %v3070_v31 }
 0xd43   :  { %v3826_v32 = vpop.eup %3825 }
 0xd44   :  { %v3072_v34 = vmul.f32 %v3826_v32, %v3064_v59  ;;  %v3376_v59 = vld [vmem:[%s4406_s12] ss:$0 sm:$0xff] }
 0xd46   :  { %v3080_v36 = vmul.f32 %v3370_v33, %v3072_v34 }
 0xd48   :  { %v3088_v37 = vadd.f32 %v3371_v35, %v3080_v36 }
 0xd4a   :  { %3664 = vmatmul.mubr.msk.f32.vlgmr.msra.gmra.mrb[38].mxu1 %vm56_vm1, %v3088_v37 }
 0xe1d   :  { %v3169_v41 = vpop.f32.mrb[38].mxu1 }
 0xe1e   :  { %v3170_v42 = vadd.f32 %v3372_v40, %v3169_v41  ;;  %v3665_v43 = vpop.f32.mrb[39].mxu1 }
 0xe20   :  { %v3173_v44 = vmax.f32 %v3170_v42, 0.0 }
 0xe22   :  { %3699 = vmatmul.mubr.f32.vlgmr.msra.gmra.mrb[30].mxu0 %v3173_v44 }
 0xef5   :  { %v3263_v46 = vpop.f32.mrb[30].mxu0 }
 0xef6   :  { %v3264_v47 = vadd.f32 %v3374_v45, %v3263_v46  ;;  %v3700_v48 = vpop.f32.mrb[31].mxu0 }
 0xef8   :  { %v3267_v49 = vadd.f32 %v3264_v47, %v3088_v37 }
 0xefa   :  { %v3268_v50 = vsel %vm56_vm1, %v3267_v49, 0.0 }
 0xefb   :  { %3269 = vadd.xlane.f32.xlu0 %v3268_v50 }
 0xf88   :  { %v3270_v51 = vpop.xlane.xlu0 %3269 }
 0xf89   :  { %v3271_v54 = vmul.f32 0.03125, %v3270_v51 }
 0xf8b   :  { %v3272_v15 = vsub.f32 %v3267_v49, %v3271_v54 }
 0xf8d   :  { %v3273_v55 = vmul.f32 %v3272_v15, %v3272_v15 }
 0xf8f   :  { %v3274_v57 = vsel %vm56_vm1, %v3273_v55, 0.0 }
 0xf90   :  { %3275 = vadd.xlane.f32.xlu1 %v3274_v57 }
0x101d   :  { %v3276_v58 = vpop.xlane.xlu1 %3275 }
0x101e   :  { %v3277_v52 = vmul.f32 0.03125, %v3276_v58 }
0x1020   :  { %v3278_v53 = vadd.f32 1e-05, %v3277_v52 }
0x1022   :  { %3827 = vrsqrt.f32 %v3278_v53 }
0x102c   :  { %v3828_v56 = vpop.eup %3827 }
0x102d   :  { %v3280_v12 = vmul.f32 %v3828_v56, %v3272_v15 }
0x102f   :  { %v3288_v60 = vmul.f32 %v3375_v10, %v3280_v12 }
0x1031   :  { %v3296_v4 = vadd.f32 %v3376_v59, %v3288_v60 }
0x1033   :  { %3297 = vst.msk [vmem:[%s4407_s13] sm:$0xff] %vm56_vm1, %v3296_v4 }

</bundles_post_ra>
